<compile_context>
chip_gen: v7x
topology: tpu7x:2x2x1
jax: 0.10.0
libtpu: 0.0.40
codegen_flags: <defaults>
</compile_context>

<pallas_src>
import numpy as np

import jax
import jax.numpy as jnp
from jax.experimental import pallas as pl
from jax.experimental.pallas import tpu as pltpu

C1, C2, C3 = 32, 16, 32   # conv1-out, conv2-out, convT1-out channels


def _pick_batch_tile(n):
    """Images per grid step: batch into matmul M, but keep >=2 grid steps (v7x)."""
    if n <= 2:
        return 1
    for bt in (16, 8, 4, 2):
        if n % bt == 0 and n // bt >= 2:
            return bt
    return 1


# ----------------------------------------------------------------------------
# Fused kernel
# ----------------------------------------------------------------------------

def make_fused_kernel(Bt, H, W):
    H2, W2 = H // 2, W // 2
    H3, W3 = H // 4, W // 4
    WC1 = W2 * C1
    f32 = jnp.float32

    def kernel(x_ref, band1_ref, b1_ref, band2_ref, b2_ref,
               blk1_ref, bt1_ref, blk2_ref, bt2_ref,
               o_ref, c1_s, p1_s, c2_s, p2_s):
        # ---- conv1: 1->32, 3x3, pad 1, + ReLU  (single banded matmul) --------
        # c1_s[b, i, dy*W + u] = x[b, i+dy-1, u]  (zero outside -> H padding)
        x_in = x_ref[...]                                        # (Bt, H, W)
        c1_s[...] = jnp.zeros(c1_s.shape, f32)
        c1_s[:, 1:H, 0:W] = x_in[:, 0:H - 1, :]                  # tap dy = 0
        c1_s[:, :, W:2 * W] = x_in                               # tap dy = 1
        c1_s[:, 0:H - 1, 2 * W:3 * W] = x_in[:, 1:H, :]          # tap dy = 2
        y1 = jnp.dot(c1_s[...].reshape(Bt * H, 3 * W), band1_ref[...],
                     preferred_element_type=f32)
        y1 = jnp.maximum(y1 + b1_ref[...], 0.0)                  # (Bt*H, W*C1), cols (j, co)

        # ---- maxpool 2x2 -----------------------------------------------------
        y1r = y1.reshape(Bt, H2, 2, W * C1)
        y1h = jnp.maximum(y1r[:, :, 0, :], y1r[:, :, 1, :])      # (Bt, H2, W*C1)
        for j in range(W2):                                      # pool along W
            p1_s[:, :, j * C1:(j + 1) * C1] = jnp.maximum(
                y1h[:, :, (2 * j) * C1:(2 * j) * C1 + C1],
                y1h[:, :, (2 * j + 1) * C1:(2 * j + 1) * C1 + C1])

        # ---- conv2: 32->16, 3x3, pad 1, + ReLU  (single banded matmul) -------
        # p1_s[b, i2, j2*C1 + ci] = pooled1[b, ci, i2, j2]
        p1 = p1_s[...]                                           # (Bt, H2, W2*C1)
        c2_s[...] = jnp.zeros(c2_s.shape, f32)
        c2_s[:, 1:H2, 0:WC1] = p1[:, 0:H2 - 1, :]
        c2_s[:, :, WC1:2 * WC1] = p1
        c2_s[:, 0:H2 - 1, 2 * WC1:3 * WC1] = p1[:, 1:H2, :]
        y2 = jnp.dot(c2_s[...].reshape(Bt * H2, 3 * WC1), band2_ref[...],
                     preferred_element_type=f32)
        y2 = jnp.maximum(y2 + b2_ref[...], 0.0)                  # (Bt*H2, W2*C2)

        # ---- maxpool 2x2 -----------------------------------------------------
        y2r = y2.reshape(Bt, H3, 2, W2 * C2)
        y2h = jnp.maximum(y2r[:, :, 0, :], y2r[:, :, 1, :])      # (Bt, H3, W2*C2)
        for j in range(W3):
            p2_s[:, :, j * C2:(j + 1) * C2] = jnp.maximum(
                y2h[:, :, (2 * j) * C2:(2 * j) * C2 + C2],
                y2h[:, :, (2 * j + 1) * C2:(2 * j + 1) * C2 + C2])

        # ---- convT1: 16->32, k2, s2, + ReLU (block-diagonal, all 4 taps) -----
        # cols of y3: (j3, k3=dy*2+dx, co)  -> 512 lanes
        x3 = p2_s[...].reshape(Bt * H3, W3 * C2)
        y3 = jnp.dot(x3, blk1_ref[...], preferred_element_type=f32)
        y3 = jnp.maximum(y3 + bt1_ref[...], 0.0)                 # (Bt*H3, W3*4*C3)

        # ---- convT2: 32->1, k2, s2, + Sigmoid (block-diagonal) ---------------
        # cols of y4: (j3, k3, k4)
        y4 = jnp.dot(y3, blk2_ref[...], preferred_element_type=f32)
        y4 = jax.nn.sigmoid(y4 + bt2_ref[...])                   # (Bt*H3, W3*16)

        o_ref[...] = y4.reshape(Bt, H3, W3 * 16).astype(o_ref.dtype)

    return kernel


# ----------------------------------------------------------------------------
# Host-side weight packing (done once, outside the forward path)
# ----------------------------------------------------------------------------

def pack_params(params, H=16, W=16):
    """Repack PyTorch-layout weights into the matmul forms the fused kernel uses:
    banded 3x3-conv weights along W and block-diagonal k2/s2 transpose-conv weights."""
    del H  # only W enters the packed weights
    w1, b1, w2, b2, wt1, bt1, wt2, bt2 = [np.asarray(p, np.float32) for p in params]
    W2_, W3_ = W // 2, W // 4

    # conv1: rows (dy, u), cols (j, co);  y1[., j*C1+co] = sum x[i+dy-1, j+dx-1]*w1
    band1 = np.zeros((3 * W, W * C1), np.float32)
    for dy in range(3):
        for dx in range(3):
            for j in range(W):
                u = j + dx - 1
                if 0 <= u < W:
                    band1[dy * W + u, j * C1:(j + 1) * C1] = w1[:, 0, dy, dx]
    b1t = np.tile(b1, W).reshape(1, W * C1)

    # conv2: rows (dy, u, ci), cols (j, co)
    band2 = np.zeros((3 * W2_ * C1, W2_ * C2), np.float32)
    for dy in range(3):
        for dx in range(3):
            for j in range(W2_):
                u = j + dx - 1
                if 0 <= u < W2_:
                    r0 = dy * W2_ * C1 + u * C1
                    band2[r0:r0 + C1, j * C2:(j + 1) * C2] = w2[:, :, dy, dx].T
    b2t = np.tile(b2, W2_).reshape(1, W2_ * C2)

    # convT1: block-diagonal over j3; rows (j3, ci), cols (j3, k3, co)
    blk1 = np.zeros((W3_ * C2, W3_ * 4 * C3), np.float32)
    for j in range(W3_):
        for dy in range(2):
            for dx in range(2):
                c0 = j * 4 * C3 + (dy * 2 + dx) * C3
                blk1[j * C2:(j + 1) * C2, c0:c0 + C3] = wt1[:, :, dy, dx]
    bt1t = np.tile(bt1, W3_ * 4).reshape(1, W3_ * 4 * C3)

    # convT2: block-diagonal over (j3, k3); rows (j3, k3, ci), cols (j3, k3, k4)
    blk2 = np.zeros((W3_ * 4 * C3, W3_ * 16), np.float32)
    for j in range(W3_):
        for k3 in range(4):
            r0 = j * 4 * C3 + k3 * C3
            c0 = j * 16 + k3 * 4
            for dy in range(2):
                for dx in range(2):
                    blk2[r0:r0 + C3, c0 + dy * 2 + dx] = wt2[:, 0, dy, dx]
    bt2t = np.full((1, W3_ * 16), float(bt2[0]), np.float32)

    return tuple(jnp.asarray(a) for a in
                 (band1, b1t, band2, b2t, blk1, bt1t, blk2, bt2t))


# ----------------------------------------------------------------------------
# Forward wrapper
# ----------------------------------------------------------------------------

@jax.jit
def denoising_autoencoder_forward(x_nchw, packed):
    band1, b1t, band2, b2t, blk1, bt1t, blk2, bt2t = packed
    N, C, H, W = x_nchw.shape
    assert C == 1 and H % 4 == 0 and W % 4 == 0
    assert band1.shape == (3 * W, W * C1), "packed params don't match input width"
    H2, W2 = H // 2, W // 2
    H3, W3 = H // 4, W // 4
    Bt = _pick_batch_tile(N)

    x = x_nchw.reshape(N, H, W)  # single input channel -> drop it

    def const_spec(a):
        return pl.BlockSpec(a.shape, lambda n: (0,) * a.ndim)

    out = pl.pallas_call(
        make_fused_kernel(Bt, H, W),
        out_shape=jax.ShapeDtypeStruct((N, H3, W3 * 16), jnp.float32),
        grid=(N // Bt,),
        in_specs=[
            pl.BlockSpec((Bt, H, W), lambda n: (n, 0, 0)),
            const_spec(band1), const_spec(b1t),
            const_spec(band2), const_spec(b2t),
            const_spec(blk1), const_spec(bt1t),
            const_spec(blk2), const_spec(bt2t),
        ],
        out_specs=pl.BlockSpec((Bt, H3, W3 * 16), lambda n: (n, 0, 0)),
        scratch_shapes=[
            pltpu.VMEM((Bt, H, 3 * W), jnp.float32),          # c1_s (conv1 taps)
            pltpu.VMEM((Bt, H2, W2 * C1), jnp.float32),       # p1_s (pooled 1)
            pltpu.VMEM((Bt, H2, 3 * W2 * C1), jnp.float32),   # c2_s (conv2 taps)
            pltpu.VMEM((Bt, H3, W3 * C2), jnp.float32),       # p2_s (pooled 2)
        ],
        compiler_params=pltpu.CompilerParams(
            dimension_semantics=("parallel",),
            vmem_limit_bytes=32 * 1024 * 1024),
    )(x, band1, b1t, band2, b2t, blk1, bt1t, blk2, bt2t)

    # Tap interleave back to spatial (tiny output; pure layout glue in XLA).
    # out[b, i3, j3*16 + (dy3*2+dx3)*4 + dy4*2+dx4] -> pixel (4i3+2dy3+dy4, 4j3+2dx3+dx4)
    out = out.reshape(N, H3, W3, 2, 2, 2, 2)
    out = jnp.transpose(out, (0, 1, 3, 5, 2, 4, 6)).reshape(N, 1, H, W)
    return out


# ----------------------------------------------------------------------------
# Pure-JAX reference (for correctness check)
# ----------------------------------------------------------------------------

def reference_forward(x_nchw, params):
    (w1, b1, w2, b2, wt1, bt1, wt2, bt2) = params

    def conv_relu_pool(x, w, b):
        y = jax.lax.conv_general_dilated(
            x, w, window_strides=(1, 1), padding=((1, 1), (1, 1)),
            dimension_numbers=("NCHW", "OIHW", "NCHW"))
        y = jnp.maximum(y + b[None, :, None, None], 0.0)
        N, C, H, W = y.shape
        return y.reshape(N, C, H // 2, 2, W // 2, 2).max(axis=(3, 5))

    def conv_t(x, w, b):
        # w: (Cin, Cout, 2, 2); stride 2, kernel 2 -> non-overlapping scatter
        y = jnp.einsum("nchw,cokl->nohkwl", x, w)
        N, Co, H, _, W, _ = y.shape
        return y.reshape(N, Co, 2 * H, 2 * W) + b[None, :, None, None]

    y = conv_relu_pool(x_nchw, w1, b1)
    y = conv_relu_pool(y, w2, b2)
    y = jnp.maximum(conv_t(y, wt1, bt1), 0.0)
    y = jax.nn.sigmoid(conv_t(y, wt2, bt2))
    return y


# ----------------------------------------------------------------------------
# Parameter init + main
# ----------------------------------------------------------------------------

def init_params(key):
    ks = jax.random.split(key, 8)

    def u(k, shape, fan_in):
        bound = 1.0 / np.sqrt(fan_in)
        return jax.random.uniform(k, shape, jnp.float32, -bound, bound)

    w1 = u(ks[0], (32, 1, 3, 3), 1 * 9);    b1 = u(ks[1], (32,), 1 * 9)
    w2 = u(ks[2], (16, 32, 3, 3), 32 * 9);  b2 = u(ks[3], (16,), 32 * 9)
    wt1 = u(ks[4], (16, 32, 2, 2), 32 * 4); bt1 = u(ks[5], (32,), 32 * 4)
    wt2 = u(ks[6], (32, 1, 2, 2), 1 * 4);   bt2 = u(ks[7], (1,), 1 * 4)
    return (w1, b1, w2, b2, wt1, bt1, wt2, bt2)


if __name__ == "__main__":
    key = jax.random.PRNGKey(0)
    kp, kx = jax.random.split(key)
    params = init_params(kp)

    # NCHW input consistent with Conv2d(1, ...): batch=2, 1 channel, 16x16
    x = jax.random.uniform(kx, (2, 1, 16, 16), dtype=jnp.float32)

    packed = pack_params(params, H=16, W=16)   # host-side, once

    out = denoising_autoencoder_forward(x, packed)
    out = jax.block_until_ready(out)

    ref = reference_forward(x, params)
    assert out.shape == (2, 1, 16, 16), out.shape
    assert out.dtype == jnp.float32
    assert jnp.allclose(out, ref, atol=2e-4, rtol=2e-4), (
        float(jnp.max(jnp.abs(out - ref))))

    print("KERNEL_OK")
</pallas_src>

<mosaic_0001>
module attributes {stable_mosaic.version = 11 : i64} {
  func.func @kernel(%arg0: i32, %arg1: memref<1x16x16xf32, #tpu.memory_space<vmem>>, %arg2: memref<48x512xf32, #tpu.memory_space<vmem>>, %arg3: memref<1x512xf32, #tpu.memory_space<vmem>>, %arg4: memref<768x128xf32, #tpu.memory_space<vmem>>, %arg5: memref<1x128xf32, #tpu.memory_space<vmem>>, %arg6: memref<64x512xf32, #tpu.memory_space<vmem>>, %arg7: memref<1x512xf32, #tpu.memory_space<vmem>>, %arg8: memref<512x64xf32, #tpu.memory_space<vmem>>, %arg9: memref<1x64xf32, #tpu.memory_space<vmem>>, %arg10: memref<1x4x64xf32, #tpu.memory_space<vmem>>, %arg11: memref<1x16x48xf32, #tpu.memory_space<vmem>>, %arg12: memref<1x8x256xf32, #tpu.memory_space<vmem>>, %arg13: memref<1x8x768xf32, #tpu.memory_space<vmem>>, %arg14: memref<1x4x64xf32, #tpu.memory_space<vmem>>) attributes {dimension_semantics = [#tpu.dimension_semantics<parallel>], iteration_bounds = array<i64: 2>, scalar_prefetch = 0 : i64, scratch_operands = 4 : i64, tpu.core_type = #tpu.core_type<tc>, window_params = [{transform_indices = @transform_0, window_bounds = array<i64: 1, 16, 16>}, {pipeline_mode = #tpu.pipeline_mode<synchronous>, transform_indices = @transform_1, window_bounds = array<i64: 48, 512>}, {pipeline_mode = #tpu.pipeline_mode<synchronous>, transform_indices = @transform_2, window_bounds = array<i64: 1, 512>}, {pipeline_mode = #tpu.pipeline_mode<synchronous>, transform_indices = @transform_3, window_bounds = array<i64: 768, 128>}, {pipeline_mode = #tpu.pipeline_mode<synchronous>, transform_indices = @transform_4, window_bounds = array<i64: 1, 128>}, {pipeline_mode = #tpu.pipeline_mode<synchronous>, transform_indices = @transform_5, window_bounds = array<i64: 64, 512>}, {pipeline_mode = #tpu.pipeline_mode<synchronous>, transform_indices = @transform_6, window_bounds = array<i64: 1, 512>}, {pipeline_mode = #tpu.pipeline_mode<synchronous>, transform_indices = @transform_7, window_bounds = array<i64: 512, 64>}, {pipeline_mode = #tpu.pipeline_mode<synchronous>, transform_indices = @transform_8, window_bounds = array<i64: 1, 64>}, {transform_indices = @transform_9, window_bounds = array<i64: 1, 4, 64>}]} {
    %c0 = arith.constant 0 : index
    %c0_0 = arith.constant 0 : index
    %c0_1 = arith.constant 0 : index
    %0 = vector.load %arg1[%c0, %c0_0, %c0_1] : memref<1x16x16xf32, #tpu.memory_space<vmem>>, vector<1x16x16xf32>
    %cst = arith.constant 0.000000e+00 : f32
    %1 = vector.broadcast %cst : f32 to vector<1x16x48xf32>
    %c0_2 = arith.constant 0 : index
    %c0_3 = arith.constant 0 : index
    %c0_4 = arith.constant 0 : index
    %2 = vector.load %arg11[%c0_2, %c0_3, %c0_4] : memref<1x16x48xf32, #tpu.memory_space<vmem>>, vector<1x16x48xf32>
    tpu.vector_store %arg11[%c0_2, %c0_3, %c0_4], %1 {strides = array<i32>} : memref<1x16x48xf32, #tpu.memory_space<vmem>>, vector<1x16x48xf32>,
    %3 = vector.extract_strided_slice %0 {offsets = [0, 0, 0], sizes = [1, 15, 16], strides = [1, 1, 1]} : vector<1x16x16xf32> to vector<1x15x16xf32>
    %c0_5 = arith.constant 0 : index
    %c1 = arith.constant 1 : index
    %c0_6 = arith.constant 0 : index
    %4 = vector.load %arg11[%c0_5, %c1, %c0_6] : memref<1x16x48xf32, #tpu.memory_space<vmem>>, vector<1x15x16xf32>
    tpu.vector_store %arg11[%c0_5, %c1, %c0_6], %3 {strides = array<i32>} : memref<1x16x48xf32, #tpu.memory_space<vmem>>, vector<1x15x16xf32>,
    %c0_7 = arith.constant 0 : index
    %c0_8 = arith.constant 0 : index
    %c16 = arith.constant 16 : index
    %5 = vector.load %arg11[%c0_7, %c0_8, %c16] : memref<1x16x48xf32, #tpu.memory_space<vmem>>, vector<1x16x16xf32>
    tpu.vector_store %arg11[%c0_7, %c0_8, %c16], %0 {strides = array<i32>} : memref<1x16x48xf32, #tpu.memory_space<vmem>>, vector<1x16x16xf32>,
    %6 = vector.extract_strided_slice %0 {offsets = [0, 1, 0], sizes = [1, 15, 16], strides = [1, 1, 1]} : vector<1x16x16xf32> to vector<1x15x16xf32>
    %c0_9 = arith.constant 0 : index
    %c0_10 = arith.constant 0 : index
    %c32 = arith.constant 32 : index
    %7 = vector.load %arg11[%c0_9, %c0_10, %c32] : memref<1x16x48xf32, #tpu.memory_space<vmem>>, vector<1x15x16xf32>
    tpu.vector_store %arg11[%c0_9, %c0_10, %c32], %6 {strides = array<i32>} : memref<1x16x48xf32, #tpu.memory_space<vmem>>, vector<1x15x16xf32>,
    %c0_11 = arith.constant 0 : index
    %c0_12 = arith.constant 0 : index
    %c0_13 = arith.constant 0 : index
    %8 = vector.load %arg11[%c0_11, %c0_12, %c0_13] : memref<1x16x48xf32, #tpu.memory_space<vmem>>, vector<1x16x48xf32>
    %9 = vector.shape_cast %8 : vector<1x16x48xf32> to vector<16x48xf32>
    %c0_14 = arith.constant 0 : index
    %c0_15 = arith.constant 0 : index
    %10 = vector.load %arg2[%c0_14, %c0_15] : memref<48x512xf32, #tpu.memory_space<vmem>>, vector<48x512xf32>
    %cst_16 = arith.constant dense<0.000000e+00> : vector<16x512xf32>
    %11 = tpu.matmul %9, %10, %cst_16 {dimension_numbers = #tpu.dot_dimension_numbers<[1], [0], [0], [1], [0, 0, 1, 1], [], []>} : vector<16x48xf32>, vector<48x512xf32>, vector<16x512xf32> -> vector<16x512xf32>
    %c0_17 = arith.constant 0 : index
    %c0_18 = arith.constant 0 : index
    %12 = vector.load %arg3[%c0_17, %c0_18] : memref<1x512xf32, #tpu.memory_space<vmem>>, vector<1x512xf32>
    %13 = vector.broadcast %12 : vector<1x512xf32> to vector<16x512xf32>
    %14 = arith.addf %11, %13 : vector<16x512xf32>
    %cst_19 = arith.constant 0.000000e+00 : f32
    %15 = vector.broadcast %cst_19 : f32 to vector<16x512xf32>
    %16 = arith.maximumf %14, %15 : vector<16x512xf32>
    %17 = vector.shape_cast %16 : vector<16x512xf32> to vector<1x8x2x512xf32>
    %18 = vector.extract_strided_slice %17 {offsets = [0, 0, 0, 0], sizes = [1, 8, 1, 512], strides = [1, 1, 1, 1]} : vector<1x8x2x512xf32> to vector<1x8x1x512xf32>
    %19 = vector.shape_cast %18 : vector<1x8x1x512xf32> to vector<1x8x512xf32>
    %20 = vector.extract_strided_slice %17 {offsets = [0, 0, 1, 0], sizes = [1, 8, 1, 512], strides = [1, 1, 1, 1]} : vector<1x8x2x512xf32> to vector<1x8x1x512xf32>
    %21 = vector.shape_cast %20 : vector<1x8x1x512xf32> to vector<1x8x512xf32>
    %22 = arith.maximumf %19, %21 : vector<1x8x512xf32>
    %23 = vector.extract_strided_slice %22 {offsets = [0, 0, 0], sizes = [1, 8, 32], strides = [1, 1, 1]} : vector<1x8x512xf32> to vector<1x8x32xf32>
    %24 = vector.extract_strided_slice %22 {offsets = [0, 0, 32], sizes = [1, 8, 32], strides = [1, 1, 1]} : vector<1x8x512xf32> to vector<1x8x32xf32>
    %25 = arith.maximumf %23, %24 : vector<1x8x32xf32>
    %c0_20 = arith.constant 0 : index
    %c0_21 = arith.constant 0 : index
    %c0_22 = arith.constant 0 : index
    %26 = vector.load %arg12[%c0_20, %c0_21, %c0_22] : memref<1x8x256xf32, #tpu.memory_space<vmem>>, vector<1x8x32xf32>
    tpu.vector_store %arg12[%c0_20, %c0_21, %c0_22], %25 {strides = array<i32>} : memref<1x8x256xf32, #tpu.memory_space<vmem>>, vector<1x8x32xf32>,
    %27 = vector.extract_strided_slice %22 {offsets = [0, 0, 64], sizes = [1, 8, 32], strides = [1, 1, 1]} : vector<1x8x512xf32> to vector<1x8x32xf32>
    %28 = vector.extract_strided_slice %22 {offsets = [0, 0, 96], sizes = [1, 8, 32], strides = [1, 1, 1]} : vector<1x8x512xf32> to vector<1x8x32xf32>
    %29 = arith.maximumf %27, %28 : vector<1x8x32xf32>
    %c0_23 = arith.constant 0 : index
    %c0_24 = arith.constant 0 : index
    %c32_25 = arith.constant 32 : index
    %30 = vector.load %arg12[%c0_23, %c0_24, %c32_25] : memref<1x8x256xf32, #tpu.memory_space<vmem>>, vector<1x8x32xf32>
    tpu.vector_store %arg12[%c0_23, %c0_24, %c32_25], %29 {strides = array<i32>} : memref<1x8x256xf32, #tpu.memory_space<vmem>>, vector<1x8x32xf32>,
    %31 = vector.extract_strided_slice %22 {offsets = [0, 0, 128], sizes = [1, 8, 32], strides = [1, 1, 1]} : vector<1x8x512xf32> to vector<1x8x32xf32>
    %32 = vector.extract_strided_slice %22 {offsets = [0, 0, 160], sizes = [1, 8, 32], strides = [1, 1, 1]} : vector<1x8x512xf32> to vector<1x8x32xf32>
    %33 = arith.maximumf %31, %32 : vector<1x8x32xf32>
    %c0_26 = arith.constant 0 : index
    %c0_27 = arith.constant 0 : index
    %c64 = arith.constant 64 : index
    %34 = vector.load %arg12[%c0_26, %c0_27, %c64] : memref<1x8x256xf32, #tpu.memory_space<vmem>>, vector<1x8x32xf32>
    tpu.vector_store %arg12[%c0_26, %c0_27, %c64], %33 {strides = array<i32>} : memref<1x8x256xf32, #tpu.memory_space<vmem>>, vector<1x8x32xf32>,
    %35 = vector.extract_strided_slice %22 {offsets = [0, 0, 192], sizes = [1, 8, 32], strides = [1, 1, 1]} : vector<1x8x512xf32> to vector<1x8x32xf32>
    %36 = vector.extract_strided_slice %22 {offsets = [0, 0, 224], sizes = [1, 8, 32], strides = [1, 1, 1]} : vector<1x8x512xf32> to vector<1x8x32xf32>
    %37 = arith.maximumf %35, %36 : vector<1x8x32xf32>
    %c0_28 = arith.constant 0 : index
    %c0_29 = arith.constant 0 : index
    %c96 = arith.constant 96 : index
    %38 = vector.load %arg12[%c0_28, %c0_29, %c96] : memref<1x8x256xf32, #tpu.memory_space<vmem>>, vector<1x8x32xf32>
    tpu.vector_store %arg12[%c0_28, %c0_29, %c96], %37 {strides = array<i32>} : memref<1x8x256xf32, #tpu.memory_space<vmem>>, vector<1x8x32xf32>,
    %39 = vector.extract_strided_slice %22 {offsets = [0, 0, 256], sizes = [1, 8, 32], strides = [1, 1, 1]} : vector<1x8x512xf32> to vector<1x8x32xf32>
    %40 = vector.extract_strided_slice %22 {offsets = [0, 0, 288], sizes = [1, 8, 32], strides = [1, 1, 1]} : vector<1x8x512xf32> to vector<1x8x32xf32>
    %41 = arith.maximumf %39, %40 : vector<1x8x32xf32>
    %c0_30 = arith.constant 0 : index
    %c0_31 = arith.constant 0 : index
    %c128 = arith.constant 128 : index
    %42 = vector.load %arg12[%c0_30, %c0_31, %c128] : memref<1x8x256xf32, #tpu.memory_space<vmem>>, vector<1x8x32xf32>
    tpu.vector_store %arg12[%c0_30, %c0_31, %c128], %41 {strides = array<i32>} : memref<1x8x256xf32, #tpu.memory_space<vmem>>, vector<1x8x32xf32>,
    %43 = vector.extract_strided_slice %22 {offsets = [0, 0, 320], sizes = [1, 8, 32], strides = [1, 1, 1]} : vector<1x8x512xf32> to vector<1x8x32xf32>
    %44 = vector.extract_strided_slice %22 {offsets = [0, 0, 352], sizes = [1, 8, 32], strides = [1, 1, 1]} : vector<1x8x512xf32> to vector<1x8x32xf32>
    %45 = arith.maximumf %43, %44 : vector<1x8x32xf32>
    %c0_32 = arith.constant 0 : index
    %c0_33 = arith.constant 0 : index
    %c160 = arith.constant 160 : index
    %46 = vector.load %arg12[%c0_32, %c0_33, %c160] : memref<1x8x256xf32, #tpu.memory_space<vmem>>, vector<1x8x32xf32>
    tpu.vector_store %arg12[%c0_32, %c0_33, %c160], %45 {strides = array<i32>} : memref<1x8x256xf32, #tpu.memory_space<vmem>>, vector<1x8x32xf32>,
    %47 = vector.extract_strided_slice %22 {offsets = [0, 0, 384], sizes = [1, 8, 32], strides = [1, 1, 1]} : vector<1x8x512xf32> to vector<1x8x32xf32>
    %48 = vector.extract_strided_slice %22 {offsets = [0, 0, 416], sizes = [1, 8, 32], strides = [1, 1, 1]} : vector<1x8x512xf32> to vector<1x8x32xf32>
    %49 = arith.maximumf %47, %48 : vector<1x8x32xf32>
    %c0_34 = arith.constant 0 : index
    %c0_35 = arith.constant 0 : index
    %c192 = arith.constant 192 : index
    %50 = vector.load %arg12[%c0_34, %c0_35, %c192] : memref<1x8x256xf32, #tpu.memory_space<vmem>>, vector<1x8x32xf32>
    tpu.vector_store %arg12[%c0_34, %c0_35, %c192], %49 {strides = array<i32>} : memref<1x8x256xf32, #tpu.memory_space<vmem>>, vector<1x8x32xf32>,
    %51 = vector.extract_strided_slice %22 {offsets = [0, 0, 448], sizes = [1, 8, 32], strides = [1, 1, 1]} : vector<1x8x512xf32> to vector<1x8x32xf32>
    %52 = vector.extract_strided_slice %22 {offsets = [0, 0, 480], sizes = [1, 8, 32], strides = [1, 1, 1]} : vector<1x8x512xf32> to vector<1x8x32xf32>
    %53 = arith.maximumf %51, %52 : vector<1x8x32xf32>
    %c0_36 = arith.constant 0 : index
    %c0_37 = arith.constant 0 : index
    %c224 = arith.constant 224 : index
    %54 = vector.load %arg12[%c0_36, %c0_37, %c224] : memref<1x8x256xf32, #tpu.memory_space<vmem>>, vector<1x8x32xf32>
    tpu.vector_store %arg12[%c0_36, %c0_37, %c224], %53 {strides = array<i32>} : memref<1x8x256xf32, #tpu.memory_space<vmem>>, vector<1x8x32xf32>,
    %c0_38 = arith.constant 0 : index
    %c0_39 = arith.constant 0 : index
    %c0_40 = arith.constant 0 : index
    %55 = vector.load %arg12[%c0_38, %c0_39, %c0_40] : memref<1x8x256xf32, #tpu.memory_space<vmem>>, vector<1x8x256xf32>
    %cst_41 = arith.constant 0.000000e+00 : f32
    %56 = vector.broadcast %cst_41 : f32 to vector<1x8x768xf32>
    %c0_42 = arith.constant 0 : index
    %c0_43 = arith.constant 0 : index
    %c0_44 = arith.constant 0 : index
    %57 = vector.load %arg13[%c0_42, %c0_43, %c0_44] : memref<1x8x768xf32, #tpu.memory_space<vmem>>, vector<1x8x768xf32>
    tpu.vector_store %arg13[%c0_42, %c0_43, %c0_44], %56 {strides = array<i32>} : memref<1x8x768xf32, #tpu.memory_space<vmem>>, vector<1x8x768xf32>,
    %58 = vector.extract_strided_slice %55 {offsets = [0, 0, 0], sizes = [1, 7, 256], strides = [1, 1, 1]} : vector<1x8x256xf32> to vector<1x7x256xf32>
    %c0_45 = arith.constant 0 : index
    %c1_46 = arith.constant 1 : index
    %c0_47 = arith.constant 0 : index
    %59 = vector.load %arg13[%c0_45, %c1_46, %c0_47] : memref<1x8x768xf32, #tpu.memory_space<vmem>>, vector<1x7x256xf32>
    tpu.vector_store %arg13[%c0_45, %c1_46, %c0_47], %58 {strides = array<i32>} : memref<1x8x768xf32, #tpu.memory_space<vmem>>, vector<1x7x256xf32>,
    %c0_48 = arith.constant 0 : index
    %c0_49 = arith.constant 0 : index
    %c256 = arith.constant 256 : index
    %60 = vector.load %arg13[%c0_48, %c0_49, %c256] : memref<1x8x768xf32, #tpu.memory_space<vmem>>, vector<1x8x256xf32>
    tpu.vector_store %arg13[%c0_48, %c0_49, %c256], %55 {strides = array<i32>} : memref<1x8x768xf32, #tpu.memory_space<vmem>>, vector<1x8x256xf32>,
    %61 = vector.extract_strided_slice %55 {offsets = [0, 1, 0], sizes = [1, 7, 256], strides = [1, 1, 1]} : vector<1x8x256xf32> to vector<1x7x256xf32>
    %c0_50 = arith.constant 0 : index
    %c0_51 = arith.constant 0 : index
    %c512 = arith.constant 512 : index
    %62 = vector.load %arg13[%c0_50, %c0_51, %c512] : memref<1x8x768xf32, #tpu.memory_space<vmem>>, vector<1x7x256xf32>
    tpu.vector_store %arg13[%c0_50, %c0_51, %c512], %61 {strides = array<i32>} : memref<1x8x768xf32, #tpu.memory_space<vmem>>, vector<1x7x256xf32>,
    %c0_52 = arith.constant 0 : index
    %c0_53 = arith.constant 0 : index
    %c0_54 = arith.constant 0 : index
    %63 = vector.load %arg13[%c0_52, %c0_53, %c0_54] : memref<1x8x768xf32, #tpu.memory_space<vmem>>, vector<1x8x768xf32>
    %64 = vector.shape_cast %63 : vector<1x8x768xf32> to vector<8x768xf32>
    %c0_55 = arith.constant 0 : index
    %c0_56 = arith.constant 0 : index
    %65 = vector.load %arg4[%c0_55, %c0_56] : memref<768x128xf32, #tpu.memory_space<vmem>>, vector<768x128xf32>
    %cst_57 = arith.constant dense<0.000000e+00> : vector<8x128xf32>
    %66 = tpu.matmul %64, %65, %cst_57 {dimension_numbers = #tpu.dot_dimension_numbers<[1], [0], [0], [1], [0, 0, 1, 1], [], []>} : vector<8x768xf32>, vector<768x128xf32>, vector<8x128xf32> -> vector<8x128xf32>
    %c0_58 = arith.constant 0 : index
    %c0_59 = arith.constant 0 : index
    %67 = vector.load %arg5[%c0_58, %c0_59] : memref<1x128xf32, #tpu.memory_space<vmem>>, vector<1x128xf32>
    %68 = vector.broadcast %67 : vector<1x128xf32> to vector<8x128xf32>
    %69 = arith.addf %66, %68 : vector<8x128xf32>
    %cst_60 = arith.constant 0.000000e+00 : f32
    %70 = vector.broadcast %cst_60 : f32 to vector<8x128xf32>
    %71 = arith.maximumf %69, %70 : vector<8x128xf32>
    %72 = vector.shape_cast %71 : vector<8x128xf32> to vector<1x4x2x128xf32>
    %73 = vector.extract_strided_slice %72 {offsets = [0, 0, 0, 0], sizes = [1, 4, 1, 128], strides = [1, 1, 1, 1]} : vector<1x4x2x128xf32> to vector<1x4x1x128xf32>
    %74 = vector.shape_cast %73 : vector<1x4x1x128xf32> to vector<1x4x128xf32>
    %75 = vector.extract_strided_slice %72 {offsets = [0, 0, 1, 0], sizes = [1, 4, 1, 128], strides = [1, 1, 1, 1]} : vector<1x4x2x128xf32> to vector<1x4x1x128xf32>
    %76 = vector.shape_cast %75 : vector<1x4x1x128xf32> to vector<1x4x128xf32>
    %77 = arith.maximumf %74, %76 : vector<1x4x128xf32>
    %78 = vector.extract_strided_slice %77 {offsets = [0, 0, 0], sizes = [1, 4, 16], strides = [1, 1, 1]} : vector<1x4x128xf32> to vector<1x4x16xf32>
    %79 = vector.extract_strided_slice %77 {offsets = [0, 0, 16], sizes = [1, 4, 16], strides = [1, 1, 1]} : vector<1x4x128xf32> to vector<1x4x16xf32>
    %80 = arith.maximumf %78, %79 : vector<1x4x16xf32>
    %c0_61 = arith.constant 0 : index
    %c0_62 = arith.constant 0 : index
    %c0_63 = arith.constant 0 : index
    %81 = vector.load %arg14[%c0_61, %c0_62, %c0_63] : memref<1x4x64xf32, #tpu.memory_space<vmem>>, vector<1x4x16xf32>
    tpu.vector_store %arg14[%c0_61, %c0_62, %c0_63], %80 {strides = array<i32>} : memref<1x4x64xf32, #tpu.memory_space<vmem>>, vector<1x4x16xf32>,
    %82 = vector.extract_strided_slice %77 {offsets = [0, 0, 32], sizes = [1, 4, 16], strides = [1, 1, 1]} : vector<1x4x128xf32> to vector<1x4x16xf32>
    %83 = vector.extract_strided_slice %77 {offsets = [0, 0, 48], sizes = [1, 4, 16], strides = [1, 1, 1]} : vector<1x4x128xf32> to vector<1x4x16xf32>
    %84 = arith.maximumf %82, %83 : vector<1x4x16xf32>
    %c0_64 = arith.constant 0 : index
    %c0_65 = arith.constant 0 : index
    %c16_66 = arith.constant 16 : index
    %85 = vector.load %arg14[%c0_64, %c0_65, %c16_66] : memref<1x4x64xf32, #tpu.memory_space<vmem>>, vector<1x4x16xf32>
    tpu.vector_store %arg14[%c0_64, %c0_65, %c16_66], %84 {strides = array<i32>} : memref<1x4x64xf32, #tpu.memory_space<vmem>>, vector<1x4x16xf32>,
    %86 = vector.extract_strided_slice %77 {offsets = [0, 0, 64], sizes = [1, 4, 16], strides = [1, 1, 1]} : vector<1x4x128xf32> to vector<1x4x16xf32>
    %87 = vector.extract_strided_slice %77 {offsets = [0, 0, 80], sizes = [1, 4, 16], strides = [1, 1, 1]} : vector<1x4x128xf32> to vector<1x4x16xf32>
    %88 = arith.maximumf %86, %87 : vector<1x4x16xf32>
    %c0_67 = arith.constant 0 : index
    %c0_68 = arith.constant 0 : index
    %c32_69 = arith.constant 32 : index
    %89 = vector.load %arg14[%c0_67, %c0_68, %c32_69] : memref<1x4x64xf32, #tpu.memory_space<vmem>>, vector<1x4x16xf32>
    tpu.vector_store %arg14[%c0_67, %c0_68, %c32_69], %88 {strides = array<i32>} : memref<1x4x64xf32, #tpu.memory_space<vmem>>, vector<1x4x16xf32>,
    %90 = vector.extract_strided_slice %77 {offsets = [0, 0, 96], sizes = [1, 4, 16], strides = [1, 1, 1]} : vector<1x4x128xf32> to vector<1x4x16xf32>
    %91 = vector.extract_strided_slice %77 {offsets = [0, 0, 112], sizes = [1, 4, 16], strides = [1, 1, 1]} : vector<1x4x128xf32> to vector<1x4x16xf32>
    %92 = arith.maximumf %90, %91 : vector<1x4x16xf32>
    %c0_70 = arith.constant 0 : index
    %c0_71 = arith.constant 0 : index
    %c48 = arith.constant 48 : index
    %93 = vector.load %arg14[%c0_70, %c0_71, %c48] : memref<1x4x64xf32, #tpu.memory_space<vmem>>, vector<1x4x16xf32>
    tpu.vector_store %arg14[%c0_70, %c0_71, %c48], %92 {strides = array<i32>} : memref<1x4x64xf32, #tpu.memory_space<vmem>>, vector<1x4x16xf32>,
    %c0_72 = arith.constant 0 : index
    %c0_73 = arith.constant 0 : index
    %c0_74 = arith.constant 0 : index
    %94 = vector.load %arg14[%c0_72, %c0_73, %c0_74] : memref<1x4x64xf32, #tpu.memory_space<vmem>>, vector<1x4x64xf32>
    %95 = vector.shape_cast %94 : vector<1x4x64xf32> to vector<4x64xf32>
    %c0_75 = arith.constant 0 : index
    %c0_76 = arith.constant 0 : index
    %96 = vector.load %arg6[%c0_75, %c0_76] : memref<64x512xf32, #tpu.memory_space<vmem>>, vector<64x512xf32>
    %cst_77 = arith.constant dense<0.000000e+00> : vector<4x512xf32>
    %97 = tpu.matmul %95, %96, %cst_77 {dimension_numbers = #tpu.dot_dimension_numbers<[1], [0], [0], [1], [0, 0, 1, 1], [], []>} : vector<4x64xf32>, vector<64x512xf32>, vector<4x512xf32> -> vector<4x512xf32>
    %c0_78 = arith.constant 0 : index
    %c0_79 = arith.constant 0 : index
    %98 = vector.load %arg7[%c0_78, %c0_79] : memref<1x512xf32, #tpu.memory_space<vmem>>, vector<1x512xf32>
    %99 = vector.broadcast %98 : vector<1x512xf32> to vector<4x512xf32>
    %100 = arith.addf %97, %99 : vector<4x512xf32>
    %cst_80 = arith.constant 0.000000e+00 : f32
    %101 = vector.broadcast %cst_80 : f32 to vector<4x512xf32>
    %102 = arith.maximumf %100, %101 : vector<4x512xf32>
    %c0_81 = arith.constant 0 : index
    %c0_82 = arith.constant 0 : index
    %103 = vector.load %arg8[%c0_81, %c0_82] : memref<512x64xf32, #tpu.memory_space<vmem>>, vector<512x64xf32>
    %cst_83 = arith.constant dense<0.000000e+00> : vector<4x64xf32>
    %104 = tpu.matmul %102, %103, %cst_83 {dimension_numbers = #tpu.dot_dimension_numbers<[1], [0], [0], [1], [0, 0, 1, 1], [], []>} : vector<4x512xf32>, vector<512x64xf32>, vector<4x64xf32> -> vector<4x64xf32>
    %c0_84 = arith.constant 0 : index
    %c0_85 = arith.constant 0 : index
    %105 = vector.load %arg9[%c0_84, %c0_85] : memref<1x64xf32, #tpu.memory_space<vmem>>, vector<1x64xf32>
    %106 = vector.broadcast %105 : vector<1x64xf32> to vector<4x64xf32>
    %107 = arith.addf %104, %106 : vector<4x64xf32>
    %108 = arith.negf %107 : vector<4x64xf32>
    %109 = math.exp %108 : vector<4x64xf32>
    %cst_86 = arith.constant 1.000000e+00 : f32
    %110 = vector.broadcast %cst_86 : f32 to vector<4x64xf32>
    %111 = arith.addf %110, %109 : vector<4x64xf32>
    %112 = arith.divf %110, %111 : vector<4x64xf32>
    %113 = vector.shape_cast %112 : vector<4x64xf32> to vector<1x4x64xf32>
    %c0_87 = arith.constant 0 : index
    %c0_88 = arith.constant 0 : index
    %c0_89 = arith.constant 0 : index
    %114 = vector.load %arg10[%c0_87, %c0_88, %c0_89] : memref<1x4x64xf32, #tpu.memory_space<vmem>>, vector<1x4x64xf32>
    tpu.vector_store %arg10[%c0_87, %c0_88, %c0_89], %113 {strides = array<i32>} : memref<1x4x64xf32, #tpu.memory_space<vmem>>, vector<1x4x64xf32>,
    return
  }
  func.func @transform_0(%arg0: i32) -> (i32, i32, i32) {
    %c0_i32 = arith.constant 0 : i32
    %c0_i32_0 = arith.constant 0 : i32
    %c0_i32_1 = arith.constant 0 : i32
    return %arg0, %c0_i32, %c0_i32_0 : i32, i32, i32
  }
  func.func @transform_1(%arg0: i32) -> (i32, i32) {
    %c0_i32 = arith.constant 0 : i32
    %c0_i32_0 = arith.constant 0 : i32
    %c0_i32_1 = arith.constant 0 : i32
    return %c0_i32, %c0_i32_0 : i32, i32
  }
  func.func @transform_2(%arg0: i32) -> (i32, i32) {
    %c0_i32 = arith.constant 0 : i32
    %c0_i32_0 = arith.constant 0 : i32
    %c0_i32_1 = arith.constant 0 : i32
    return %c0_i32, %c0_i32_0 : i32, i32
  }
  func.func @transform_3(%arg0: i32) -> (i32, i32) {
    %c0_i32 = arith.constant 0 : i32
    %c0_i32_0 = arith.constant 0 : i32
    %c0_i32_1 = arith.constant 0 : i32
    return %c0_i32, %c0_i32_0 : i32, i32
  }
  func.func @transform_4(%arg0: i32) -> (i32, i32) {
    %c0_i32 = arith.constant 0 : i32
    %c0_i32_0 = arith.constant 0 : i32
    %c0_i32_1 = arith.constant 0 : i32
    return %c0_i32, %c0_i32_0 : i32, i32
  }
  func.func @transform_5(%arg0: i32) -> (i32, i32) {
    %c0_i32 = arith.constant 0 : i32
    %c0_i32_0 = arith.constant 0 : i32
    %c0_i32_1 = arith.constant 0 : i32
    return %c0_i32, %c0_i32_0 : i32, i32
  }
  func.func @transform_6(%arg0: i32) -> (i32, i32) {
    %c0_i32 = arith.constant 0 : i32
    %c0_i32_0 = arith.constant 0 : i32
    %c0_i32_1 = arith.constant 0 : i32
    return %c0_i32, %c0_i32_0 : i32, i32
  }
  func.func @transform_7(%arg0: i32) -> (i32, i32) {
    %c0_i32 = arith.constant 0 : i32
    %c0_i32_0 = arith.constant 0 : i32
    %c0_i32_1 = arith.constant 0 : i32
    return %c0_i32, %c0_i32_0 : i32, i32
  }
  func.func @transform_8(%arg0: i32) -> (i32, i32) {
    %c0_i32 = arith.constant 0 : i32
    %c0_i32_0 = arith.constant 0 : i32
    %c0_i32_1 = arith.constant 0 : i32
    return %c0_i32, %c0_i32_0 : i32, i32
  }
  func.func @transform_9(%arg0: i32) -> (i32, i32, i32) {
    %c0_i32 = arith.constant 0 : i32
    %c0_i32_0 = arith.constant 0 : i32
    %c0_i32_1 = arith.constant 0 : i32
    return %arg0, %c0_i32, %c0_i32_0 : i32, i32, i32
  }
}

</mosaic_0001>

<bundles_post_ra>
// kernel: denoising_autoencoder_forward.1
= control target key start
LH: loop header
LB: loop body
LE: loop exit
PB: predicated region body
PF: predicated region fallthrough
CT: control target
= control target key end

     0   :  { %14 = vsyncpa [#allocation7], 0  ;;  %s4231_s0 = inlined_call_operand.hbm [shape: f32[2,16,16], index: 0, kind: input, shape index: {}]   ;;  %s4232_s1 = inlined_call_operand.hbm [shape: f32[48,512], index: 1, kind: input, shape index: {}]   ;;  %s4233_s2 = inlined_call_operand.vmem [shape: f32[1,512], index: 2, kind: input, shape index: {}]   ;;  %s4234_s3 = inlined_call_operand.vmem [shape: f32[768,128], index: 3, kind: input, shape index: {}]   ;;  %s4235_s4 = inlined_call_operand.vmem [shape: f32[1,128], index: 4, kind: input, shape index: {}]   ;;  %s4236_s5 = inlined_call_operand.hbm [shape: f32[64,512], index: 5, kind: input, shape index: {}]   ;;  %s4237_s6 = inlined_call_operand.vmem [shape: f32[1,512], index: 6, kind: input, shape index: {}]   ;;  %s4238_s7 = inlined_call_operand.vmem [shape: f32[512,64], index: 7, kind: input, shape index: {}]   ;;  %s4239_s8 = inlined_call_operand.vmem [shape: f32[1,64], index: 8, kind: input, shape index: {}]   ;;  %s4240_s9 = inlined_call_operand.vmem [shape: f32[2,4,64], index: 9, kind: output, shape index: {}]  }
   0x1   :  { %16 = vsyncpa [#allocation7 + $0x1], 0 }
   0x2   :  { %17 = vsyncpa [#allocation9], 0  ;;  %s3072_s30 = smov 0   ;;  %s3074_s10 = smov 0  }
   0x3   :  { %s3076_s11 = smov 0   ;;  %s3078_s12 = smov 0  }
   0x4 LB: > { %s3091_s13 = sadd.s32 4294967295, %s3005_s12   ;;  %p43_p0 = scmp.ne.s32.totalorder %s2997_s10, %s2993_s30  ;;  %s3005_s12 = sphi %s3078_s12, %s4282_s12   ;;  %s3001_s11 = sphi %s3076_s11, %s4281_s11   ;;  %s2997_s10 = sphi %s3074_s10, %s4280_s10   ;;  %s2993_s30 = sphi %s3072_s30, %s4279_s30  }
   0x5   : > { %p4241_p1 = scmp.eq.s32.totalorder %s3091_s13, 0  ;;  %p2378_p2 = scmp.ge.s32.totalorder %s3005_s12, 1 }
   0x6   : > { %p248_p3 = scmp.lt.s32.totalorder %s3005_s12, 3  ;;  %s3007_s16 = smov [#allocation8]  }
   0x7   : > { %p3099_p4 = por %p4241_p1, %p43_p0  ;;  %s260_s17 = sshll.u32 %s3007_s16, 4  ;;  %s261_s17 = int_to_ptr.vmem [resolvable:$true] %s260_s17 }
   0x8   : > { %p3103_p5 = pnand %p2378_p2, %p248_p3  ;;  %s3008_s19 = smov [#allocation10]  }
   0x9   : > { %s4249_s14 = scalar_select %p3099_p4, 1, 0 }
   0xa   : > { %s4250_s15 = scalar_select %p3103_p5, 1, 0 }
   0xb   : > { %p2815_p6 = pneg %p3103_p5  ;;  %s282_s20 = sshll.u32 %s3008_s19, 4  ;;  %s3115_s20 = int_to_ptr.vmem [resolvable:$true] %s282_s20 }
   0xc   : > { %s2881_s23 = scalar_lea.hbm %s4232_s1, 3072 }
   0xd   : > { %p3111_p7 = pnand %p2815_p6, %p4241_p1  ;;  %p2882_p8 = scmp.ne.s32.totalorder %s4232_s1, %s2881_s23 }
   0xe   : > { %p2888_p12 = scmp.lt.u32.totalorder %s2881_s23, %s4232_s1 }
   0xf   : > { %p2883_p9 = pneg %p3111_p7 }
  0x11   : > { %p2884_p10 = pnand %p2883_p9, %p2882_p8 }
  0x13   : > { %p2885_p11 = pneg %p2884_p10 }
  0x15   : > { %p2890_p13 = pnand %p2888_p12, %p2885_p11 }
  0x17   : > { %2893 = shalt.err (!%p2890_p13)
}
  0x18   : > { %s2894_s28 = scalar_lea.vmem %s261_s17, 3072  ;;  %p2902_p6 = scmp.lt.s32.totalorder %s261_s17, %s261_s17 }
  0x19   : > { %p2895_p0 = scmp.ne.s32.totalorder %s261_s17, %s2894_s28  ;;  %p2903_p1 = scmp.lt.s32.totalorder %s2894_s28, %s2894_s28 }
  0x1b   : > { %p2897_p2 = pnand %p2895_p0, %p2883_p9  ;;  %p2904_p4 = por %p2903_p1, %p2902_p6 }
  0x1d   : > { %p2898_p3 = pneg %p2897_p2 }
  0x1f   : > { %p2905_p5 = pnand %p2904_p4, %p2898_p3 }
  0x21   : > { %2908 = shalt.err (!%p2905_p5)
}
  0x22   : > { %s3009_s29 = smov 512   ;;  %s3010_s30 = smov 32  }
  0x23   : > { %2818 = dma.hbm_to_vmem [thread:$0]  (!%p3111_p7), %s4232_s1, 3072, %s261_s17, [#allocation9], %s3009_s29, %s3009_s29, %s3010_s30  }
  0x24   : > { %s2909_s23 = scalar_lea.hbm %s4236_s5, 4096 }
  0x25   : > { %p2910_p8 = scmp.ne.s32.totalorder %s4236_s5, %s2909_s23  ;;  %p2916_p5 = scmp.lt.u32.totalorder %s2909_s23, %s4236_s5 }
  0x27   : > { %p2912_p1 = pnand %p2910_p8, %p2883_p9 }
  0x29   : > { %p2913_p4 = pneg %p2912_p1 }
  0x2b   : > { %p2918_p10 = pnand %p2916_p5, %p2913_p4 }
  0x2d   : > { %2921 = shalt.err (!%p2918_p10)
}
  0x2e   : > { %s2922_s17 = scalar_lea.vmem %s3115_s20, 4096  ;;  %p2930_p0 = scmp.lt.s32.totalorder %s3115_s20, %s3115_s20 }
  0x2f   : > { %p2923_p11 = scmp.ne.s32.totalorder %s3115_s20, %s2922_s17  ;;  %p2931_p2 = scmp.lt.s32.totalorder %s2922_s17, %s2922_s17 }
  0x31   : > { %p2925_p12 = pnand %p2923_p11, %p2883_p9  ;;  %p2932_p3 = por %p2931_p2, %p2930_p0 }
  0x33   : > { %p2926_p13 = pneg %p2925_p12 }
  0x35   : > { %p2933_p6 = pnand %p2932_p3, %p2926_p13 }
  0x37   : > { %2936 = shalt.err (!%p2933_p6)
}
  0x38   : > { %2821 = dma.hbm_to_vmem [thread:$0]  (!%p3111_p7), %s4236_s5, 4096, %s3115_s20, [#allocation9], %s3009_s29, %s3009_s29, %s3010_s30  }
  0x39   : > { %s3165_s19 = sadd.s32 1, %s3005_s12   ;;  %s30_s21 = sadd.s32 1, %s3001_s11 }
  0x3a   : > { %s27_s18 = ssub.s32 %s3005_s12, %s3165_s19  ;;  %p37_p9 = scmp.ne.s32.totalorder %s3001_s11, %s2997_s10 }
  0x3b   : > { %p28_p8 = scmp.eq.s32.totalorder %s27_s18, 0  ;;  %p38_p1 = scmp.eq.s32.totalorder %s3005_s12, 0 }
  0x3c   : > { %p2828_p4 = scmp.lt.s32.totalorder %s3005_s12, 2  ;;  %s305_s22 = sand.u32 1, %s3001_s11  }
  0x3d   : > { %s3176_s23 = scalar_select %p28_p8, %s3001_s11, %s30_s21  }
  0x3e   : > { %p39_p5 = por %p38_p1, %p37_p9  ;;  %s2382_s24 = sshll.u32 %s305_s22, 4 }
  0x3f   : > { %s2413_s25 = sshll.u32 %s3005_s12, 8  ;;  %s309_s20 = scalar_lea.vmem [#allocation6], %s2382_s24 }
  0x40   : > { %s3182_s17 = scalar_lea.hbm %s4231_s0, %s2413_s25  ;;  %s316_s29 = sshll.u32 %s309_s20, 4  ;;  %s3188_s29 = int_to_ptr.vmem [resolvable:$true] %s316_s29 }
  0x41   : > { %p3184_p7 = pnand %p2828_p4, %p39_p5  ;;  %s3190_s12 = scalar_lea.sflag [#allocation7], %s305_s22 }
  0x42   : > { %s2937_s28 = scalar_lea.hbm %s3182_s17, 256  ;;  %s2942_s18 = scalar_lea.hbm %s4231_s0, 512 }
  0x43   : > { %p2938_p10 = scmp.ne.s32.totalorder %s3182_s17, %s2937_s28  ;;  %p2939_p11 = pneg %p3184_p7 }
  0x44   : > { %p2943_p0 = scmp.lt.u32.totalorder %s3182_s17, %s4231_s0  ;;  %p2944_p2 = scmp.lt.u32.totalorder %s2942_s18, %s2937_s28 }
  0x45   : > { %p2940_p12 = pnand %p2939_p11, %p2938_p10  ;;  %p2946_p6 = scmp.lt.u32.totalorder %s2937_s28, %s3182_s17 }
  0x46   : > { %p2945_p3 = por %p2944_p2, %p2943_p0 }
  0x47   : > { %p2941_p13 = pneg %p2940_p12 }
  0x48   : > { %p2947_p9 = por %p2946_p6, %p2945_p3 }
  0x4a   : > { %p2948_p8 = pnand %p2947_p9, %p2941_p13 }
  0x4c   : > { %2951 = shalt.err (!%p2948_p8)
}
  0x4d   : > { %s2952_s22 = scalar_lea.vmem %s3188_s29, 256  ;;  %s3011_s26 = smov [#allocation6]  }
  0x4e   : > { %p2953_p1 = scmp.ne.s32.totalorder %s3188_s29, %s2952_s22  ;;  %s2957_s27 = sshll.u32 %s3011_s26, 4  ;;  %s2958_s27 = int_to_ptr.vmem [resolvable:$false] %s2957_s27 }
  0x4f   : > { %s2959_s20 = scalar_lea.vmem %s2958_s27, 512  ;;  %p2960_p10 = scmp.lt.s32.totalorder %s3188_s29, %s2958_s27 }
  0x50   : > { %p2955_p4 = pnand %p2953_p1, %p2939_p11  ;;  %p2961_p12 = scmp.lt.s32.totalorder %s2959_s20, %s2952_s22 }
  0x52   : > { %p2956_p5 = pneg %p2955_p4  ;;  %p2962_p0 = por %p2961_p12, %p2960_p10 }
  0x54   : > { %p2963_p2 = pnand %p2962_p0, %p2956_p5 }
  0x56   : > { %2966 = shalt.err (!%p2963_p2)
}
  0x57   : > { %s3012_s28 = smov 128   ;;  %s3013_s16 = smov 8  }
  0x58   : > { %2825 = dma.hbm_to_vmem [thread:$0]  (!%p3184_p7), %s3182_s17, 256, %s3188_s29, %s3190_s12, %s3012_s28, %s3012_s28, %s3013_s16  }
  0x59   : > { %p4253_p11 = scmp.ne.s32.totalorder %s4250_s15, 0 }
  0x5a   : > { %s330_s21 = sand.u32 (!%p4253_p11), 1, %s2997_s10   ;;  %p4254_p13 = scmp.ne.s32.totalorder (!%p4253_p11), %s4249_s14, 0 }
  0x5b   : > { %328 = sbr.rel (%p4253_p11) target bundleno = 1762 (0x6e2), region = 56  ;;  %s2386_s18 = sshll.u32 (!%p4253_p11), %s330_s21, 4 }
  0x5c   : > { %s331_s24 = scalar_lea.sflag (!%p4253_p11), [#allocation7], %s330_s21  ;;  %s334_s25 = scalar_lea.vmem (!%p4253_p11), [#allocation6], %s2386_s18 }
  0x62   : > { %2984 = dma.done.wait (%p4254_p13), %s331_s24, 256  }
  0x63   : > { %2986 = vsyncadd (%p4254_p13), %s331_s24, 4294967040  ;;  %p4255_p3 = scmp.eq.s32.totalorder %s3091_s13, 0 }
  0x65   : > { %2988 = dma.done.wait (%p4255_p3), [#allocation9], 7168   ;;  %p4256_p6 = pmov %p4255_p3 }
  0x66   : > { %vm382_vm0 = vcmask 392192   ;;  %v4247_v0 = vmov 0.0   ;;  %vm385_vm1 = vcmask 130048   ;;  %vm387_vm2 = vcmask 129024   ;;  %v380_v1 = vld [vmem:[%s334_s25] sm:$0xff]  ;;  %v381_v2 = vld [vmem:[%s334_s25 + $0x8] sm:$0xff] }
  0x67   : > { %2990 = vsyncadd (%p4256_p6), [#allocation9], 4294960128  ;;  %383 = vst.msk [vmem:[#allocation2] sm:$0xff] %vm382_vm0, %v4247_v0  ;;  %528 = vmatprep.mubr.f32.mxu0 %v4247_v0  ;;  %605 = vmatprep.mubr.f32.mxu1 %v4247_v0  ;;  %v413_v3 = vld [vmem:[#allocation8 + $0x8] sm:$0xff]  ;;  %s3015_s14 = smov 16   ;;  %s3016_s15 = smov 32   ;;  %v438_v45 = vlaneseq }
  0x68   : > { %384 = vst.msk [vmem:[#allocation2 + $0x8] sm:$0xff] %vm382_vm0, %v4247_v0  ;;  %1428 = vst [vmem:[#allocation4] sm:$0xff] %v4247_v0  ;;  %391 = vrot.lane.b32.xlu0 %v380_v1, %s3015_s14  ;;  %400 = vrot.lane.b32.xlu1 %v380_v1, %s3016_s15  ;;  %v417_v4 = vld [vmem:[#allocation8 + $0x28] sm:$0xff]  ;;  %v415_v5 = vld [vmem:[#allocation8 + $0x18] sm:$0xff]  ;;  %vm397_vm3 = vcmask 261248   ;;  %vm406_vm4 = vcmask 392449  }
  0x69   : > { %1429 = vst [vmem:[#allocation4 + $0x8] sm:$0xff] %v4247_v0  ;;  %1432 = vst [vmem:[#allocation4 + $0x20] sm:$0xff] %v4247_v0  ;;  %v419_v6 = vld [vmem:[#allocation8 + $0x38] sm:$0xff]  ;;  %v2589_v7 = vpack.c.bf16 %v417_v4, %v413_v3  ;;  %v412_v9 = vld [vmem:[#allocation8] sm:$0xff]  ;;  %vm408_vm5 = vcmask 392448   ;;  %v3247_v46 = vshrl.u32 %v438_v45, 7 }
  0x6a   : > { %1433 = vst [vmem:[#allocation4 + $0x28] sm:$0xff] %v4247_v0  ;;  %386 = vst.msk [vmem:[#allocation2 + $0x1] sm:$0xff] %vm385_vm1, %v380_v1  ;;  %v2601_v8 = vpack.c.bf16 %v419_v6, %v415_v5  ;;  %v416_v10 = vld [vmem:[#allocation8 + $0x20] sm:$0xff]  ;;  %v414_v11 = vld [vmem:[#allocation8 + $0x10] sm:$0xff]  ;;  %v3017_v52 = vmov 1983009808  }
  0x6b   : > { %388 = vst.msk [vmem:[#allocation2 + $0x9] sm:$0x7f] %vm387_vm2, %v381_v2  ;;  %v2591_v12 = vpack.c.bf16 %v416_v10, %v412_v9  ;;  %v418_v13 = vld [vmem:[#allocation8 + $0x30] sm:$0xff]  ;;  %v421_v14 = vld [vmem:[#allocation8 + $0x48] sm:$0xff]  ;;  %2590 = vmatprep.subr.bf16.mxu0 %v2589_v7  ;;  %v423_v18 = vld [vmem:[#allocation8 + $0x58] sm:$0xff]  ;;  %v3250_v47 = vsub.s32 0, %v3247_v46  ;;  %v639_v53 = vunpack.c.l.s4 %v3017_v52 }
  0x6c   : > { %v425_v15 = vld [vmem:[#allocation8 + $0x68] sm:$0xff]  ;;  %2602 = vmatprep.subr.bf16.mxu1 %v2601_v8  ;;  %v2603_v16 = vpack.c.bf16 %v418_v13, %v414_v11  ;;  %v427_v19 = vld [vmem:[#allocation8 + $0x78] sm:$0xff]  ;;  %v420_v20 = vld [vmem:[#allocation8 + $0x40] sm:$0xff]  ;;  %393 = vrot.lane.b32.xlu0 %v381_v2, %s3015_s14  ;;  %v4245_v48 = vsub.s32 2, %v3247_v46  ;;  %v4246_v50 = vsub.s32 1, %v3247_v46  ;;  %v4244_v51 = vsub.s32 3, %v3247_v46 }
  0x6d   : > { %v2593_v17 = vpack.c.bf16 %v425_v15, %v421_v14  ;;  %402 = vrot.lane.b32.xlu1 %v381_v2, %s3016_s15  ;;  %v2605_v21 = vpack.c.bf16 %v427_v19, %v423_v18  ;;  %v424_v22 = vld [vmem:[#allocation8 + $0x60] sm:$0xff]  ;;  %v422_v23 = vld [vmem:[#allocation8 + $0x50] sm:$0xff]  ;;  %2592 = vmatpush1.bf16.msra.mxu0 %v2591_v12  ;;  %v429_v27 = vld [vmem:[#allocation8 + $0x88] sm:$0xff]  ;;  %v640_v60 = vunpack.c.0.s8 %v639_v53  ;;  %s3018_s30 = smov 64   ;;  %s3019_s12 = smov 96   ;;  %vm826_vm6 = vcmask 1041409  }
  0x6e   : > { %v426_v24 = vld [vmem:[#allocation8 + $0x70] sm:$0xff]  ;;  %2604 = vmatpush1.bf16.msra.mxu1 %v2603_v16  ;;  %v2595_v25 = vpack.c.bf16 %v424_v22, %v420_v20  ;;  %v433_v28 = vld [vmem:[#allocation8 + $0xa8] sm:$0xff]  ;;  %v431_v29 = vld [vmem:[#allocation8 + $0x98] sm:$0xff]  ;;  %vm828_vm7 = vcmask 1042434   ;;  %vm830_vm8 = vcmask 1043459   ;;  %vm832_vm9 = vcmask 1044484  }
  0x6f   : > { %v2607_v26 = vpack.c.bf16 %v426_v24, %v422_v23  ;;  %2594 = vmatprep.subr.bf16.mxu0 %v2593_v17  ;;  %2606 = vmatprep.subr.bf16.mxu1 %v2605_v21  ;;  %v2597_v30 = vpack.c.bf16 %v433_v28, %v429_v27  ;;  %v435_v31 = vld [vmem:[#allocation8 + $0xb8] sm:$0xff]  ;;  %v428_v32 = vld [vmem:[#allocation8 + $0x80] sm:$0xff]  ;;  %v430_v35 = vld [vmem:[#allocation8 + $0x90] sm:$0xff]  ;;  %v3266_v6 = vsub.s32 %v640_v60, %v3247_v46  ;;  %vm834_vm10 = vcmask 1045509   ;;  %s3020_s20 = smov 112   ;;  %s3021_s28 = smov 80  }
  0x70   : > { %v432_v33 = vld [vmem:[#allocation8 + $0xa0] sm:$0xff]  ;;  %v2609_v34 = vpack.c.bf16 %v435_v31, %v431_v29  ;;  %v434_v36 = vld [vmem:[#allocation8 + $0xb0] sm:$0xff]  ;;  %v436_v49 = vld [vmem:[%s4233_s2] sm:$0xf]  ;;  %vm836_vm11 = vcmask 1046534   ;;  %vm838_vm12 = vcmask 1047559  }
  0x71   : > { %2596 = vmatpush1.bf16.msra.mxu0 %v2595_v25  ;;  %v2599_v37 = vpack.c.bf16 %v432_v33, %v428_v32  ;;  %v2611_v38 = vpack.c.bf16 %v434_v36, %v430_v35  ;;  %v441_v54 = vrot.slane %v436_v49, %v3250_v47  ;;  %v449_v55 = vrot.slane %v436_v49, %v4245_v48  ;;  %p376_p7 = scmp.lt.s32.totalorder %s3091_s13, 1 }
  0x72   : > { %2608 = vmatpush1.bf16.msra.mxu1 %v2607_v26  ;;  %2598 = vmatprep.subr.bf16.mxu0 %v2597_v30  ;;  %v445_v56 = vrot.slane %v436_v49, %v4246_v50  ;;  %v453_v57 = vrot.slane %v436_v49, %v4244_v51  ;;  %vm841_vm13 = vcmask 261120   ;;  %vm846_vm14 = vcmask 523520  }
  0x73   : > { %2610 = vmatprep.subr.bf16.mxu1 %v2609_v34  ;;  %vm938_vm15 = vcmask 785920   ;;  %vm1852_vm1 = vcmask 125952   ;;  %vm1857_vm2 = vcmask 257152   ;;  %s4284_s13 = smov (!%p376_p7, %s3091_s13), 1 }
  0x74   : > { %s2389_s25 = sshll.u32 %s4284_s13, 2 }
  0x75   : > { %2600 = vmatpush1.bf16.msra.mxu0 %v2599_v37 }
  0x76   : > { %2612 = vmatpush1.bf16.msra.mxu1 %v2611_v38 }
  0xda   : > { %v392_v39 = vpop.permute.xlu0 %391  ;;  %v401_v40 = vpop.permute.xlu1 %400 }
  0xdb   : > { %398 = vst.msk [vmem:[#allocation2] sm:$0xff] %vm397_vm3, %v392_v39 }
  0xdc   : > { %407 = vst.msk [vmem:[#allocation2 - $0x1] sm:$0xfe] %vm406_vm4, %v401_v40  ;;  %vm1867_vm4 = vcmask 519552  }
  0xde   : > { %v394_v41 = vpop.permute.xlu0 %393 }
  0xdf   : > { %v403_v42 = vpop.permute.xlu1 %402  ;;  %399 = vst.msk [vmem:[#allocation2 + $0x8] sm:$0xff] %vm397_vm3, %v394_v41  ;;  %vm1862_vm3 = vcmask 388352  }
  0xe0   : > { %409 = vst.msk [vmem:[#allocation2 + $0x7] sm:$0xff] %vm408_vm5, %v403_v42  ;;  %vm1924_vm5 = vcmask 523264  }
  0xe7   : > { %v410_v43 = vld [vmem:[#allocation2] sm:$0xff]  ;;  %v411_v44 = vld [vmem:[#allocation2 + $0x8] sm:$0xff] }
  0xe8   : > { %2390 = vmatmul.mubr.msk.f32.vlgmr.msra.gmra.mrb[0].mxu0 %vm382_vm0, %v410_v43  ;;  %2392 = vmatmul.mubr.msk.f32.vlgmr.msra.gmra.mrb[0].mxu1 %vm382_vm0, %v410_v43 }
  0xe9   : > { %534 = vmatprep.mubr.f32.mxu0 %v4247_v0  ;;  %611 = vmatprep.mubr.f32.mxu1 %v4247_v0 }
  0xec   : > { %2391 = vmatmul.mubr.msk.f32.gmra.mrb[2].mxu0 %vm382_vm0, %v411_v44  ;;  %2393 = vmatmul.mubr.msk.f32.gmra.mrb[2].mxu1 %vm382_vm0, %v411_v44  ;;  %vm1062_vm0 = vcmask 1048320  }
 0x1bb   : > { %v530_v58 = vpop.f32.mrb[0].mxu0  ;;  %v607_v59 = vpop.f32.mrb[0].mxu1 }
 0x1bc   : > { %v531_v61 = vadd.f32 %v530_v58, %v441_v54  ;;  %v608_v62 = vadd.f32 %v607_v59, %v449_v55  ;;  %v532_v63 = vpop.f32.mrb[1].mxu0  ;;  %v609_v1 = vpop.f32.mrb[1].mxu1 }
 0x1bd   : > { %v533_v2 = vadd.f32 %v532_v63, %v445_v56  ;;  %v610_v3 = vadd.f32 %v609_v1, %v453_v57 }
 0x1be   : > { %v618_v4 = vmax.f32 %v531_v61, 0.0  ;;  %v620_v5 = vmax.f32 %v608_v62, 0.0 }
 0x1bf   : > { %v619_v7 = vmax.f32 %v533_v2, 0.0  ;;  %v621_v8 = vmax.f32 %v610_v3, 0.0  ;;  %v536_v9 = vpop.f32.mrb[2].mxu0  ;;  %v613_v10 = vpop.f32.mrb[2].mxu1  ;;  %v1504_v3 = vld [vmem:[%s4234_s3 + $0x180] sm:$0xff] }
 0x1c0   : > { %v537_v11 = vadd.f32 %v536_v9, %v441_v54  ;;  %v614_v12 = vadd.f32 %v613_v10, %v449_v55  ;;  %v538_v13 = vpop.f32.mrb[3].mxu0  ;;  %v615_v14 = vpop.f32.mrb[3].mxu1  ;;  %v1488_v9 = vld [vmem:[%s4234_s3 + $0x100] sm:$0xff]  ;;  %v1489_v10 = vld [vmem:[%s4234_s3 + $0x108] sm:$0xff] }
 0x1c1   : > { %v634_v15 = vcombine.low %v618_v4, %v619_v7  ;;  %v635_v16 = vcombine.high %v618_v4, %v619_v7  ;;  %v636_v17 = vcombine.low %v620_v5, %v621_v8  ;;  %v637_v18 = vcombine.high %v620_v5, %v621_v8  ;;  %v1505_v4 = vld [vmem:[%s4234_s3 + $0x188] sm:$0xff]  ;;  %v1472_v5 = vld [vmem:[%s4234_s3 + $0x80] sm:$0xff] }
 0x1c2   : > { %v622_v19 = vmax.f32 %v537_v11, 0.0  ;;  %v624_v20 = vmax.f32 %v614_v12, 0.0  ;;  %v539_v21 = vadd.f32 %v538_v13, %v445_v56  ;;  %v616_v22 = vadd.f32 %v615_v14, %v453_v57  ;;  %v1473_v8 = vld [vmem:[%s4234_s3 + $0x88] sm:$0xff]  ;;  %v1456_v13 = vld [vmem:[%s4234_s3] sm:$0xff] }
 0x1c3   : > { %v644_v23 = vrot.slane %v634_v15, %v3266_v6  ;;  %v651_v24 = vrot.slane %v635_v16, %v3266_v6  ;;  %v658_v25 = vrot.slane %v636_v17, %v3266_v6  ;;  %v665_v26 = vrot.slane %v637_v18, %v3266_v6  ;;  %v1457_v14 = vld [vmem:[%s4234_s3 + $0x8] sm:$0xff]  ;;  %v1506_v15 = vld [vmem:[%s4234_s3 + $0x190] sm:$0xff]  ;;  %v1507_v17 = vld [vmem:[%s4234_s3 + $0x198] sm:$0xff] }
 0x1c4   : > { %v623_v27 = vmax.f32 %v539_v21, 0.0  ;;  %v625_v28 = vmax.f32 %v616_v22, 0.0  ;;  %v2645_v7 = vpack.c.bf16 %v1505_v4, %v1504_v3  ;;  %v2613_v11 = vpack.c.bf16 %v1473_v8, %v1472_v5 }
 0x1c5   : > { %v666_v29 = vcombine.low %v644_v23, %v658_v25  ;;  %v667_v30 = vcombine.high %v644_v23, %v658_v25  ;;  %v668_v31 = vcombine.low %v651_v24, %v665_v26  ;;  %v669_v32 = vcombine.high %v651_v24, %v665_v26 }
 0x1c6   : > { %v670_v33 = vcombine.low %v622_v19, %v623_v27  ;;  %v671_v34 = vcombine.high %v622_v19, %v623_v27  ;;  %v672_v35 = vcombine.low %v624_v20, %v625_v28  ;;  %v673_v36 = vcombine.high %v624_v20, %v625_v28  ;;  %2646 = vmatprep.subr.bf16.mxu1 %v2645_v7 }
 0x1c7   : > { %v2394_v37 = vrot.slane %v666_v29, 9  ;;  %v2395_v38 = vrot.slane %v667_v30, 9  ;;  %v2396_v54 = vrot.slane %v668_v31, 9  ;;  %v2397_v55 = vrot.slane %v669_v32, 9  ;;  %2614 = vmatprep.subr.bf16.mxu0 %v2613_v11 }
 0x1c8   : > { %v680_v39 = vrot.slane %v670_v33, %v3266_v6  ;;  %v687_v40 = vrot.slane %v671_v34, %v3266_v6  ;;  %v694_v41 = vrot.slane %v672_v35, %v3266_v6  ;;  %v701_v42 = vrot.slane %v673_v36, %v3266_v6 }
 0x1c9   : > { %v3276_v43 = vmax.f32 %v666_v29, %v2394_v37  ;;  %v3278_v44 = vmax.f32 %v667_v30, %v2395_v38  ;;  %v3292_v56 = vmax.f32 %v668_v31, %v2396_v54  ;;  %v3298_v57 = vmax.f32 %v669_v32, %v2397_v55 }
 0x1ca   : > { %v702_v45 = vcombine.low %v680_v39, %v694_v41  ;;  %v703_v49 = vcombine.high %v680_v39, %v694_v41  ;;  %v704_v52 = vcombine.low %v687_v40, %v701_v42  ;;  %v705_v53 = vcombine.high %v687_v40, %v701_v42 }
 0x1cb   : > { %942 = vrot.lane.b32.xlu1 %v3278_v44, %s3018_s30  ;;  %940 = vrot.lane.b32.xlu0 %v3276_v43, %s3018_s30  ;;  %v2647_v12 = vpack.c.bf16 %v1489_v10, %v1488_v9  ;;  %v2615_v16 = vpack.c.bf16 %v1457_v14, %v1456_v13  ;;  %v2649_v18 = vpack.c.bf16 %v1507_v17, %v1506_v15  ;;  %v849_v19 = vrot.slane %v3278_v44, 2 }
 0x1cc   : > { %v2398_v58 = vrot.slane %v702_v45, 9  ;;  %v2399_v59 = vrot.slane %v703_v49, 9  ;;  %v2400_v62 = vrot.slane %v704_v52, 9  ;;  %v2401_v63 = vrot.slane %v705_v53, 9 }
 0x1cd   : > { %2648 = vmatpush3.bf16.msra.mxu1 %v2647_v12  ;;  %2616 = vmatpush3.bf16.msra.mxu0 %v2615_v16  ;;  %v1065_v20 = vrot.slane %v3278_v44, 4  ;;  %v1245_v21 = vrot.slane %v3278_v44, 6  ;;  %v848_v22 = vrot.slane %v3276_v43, 2  ;;  %v1064_v23 = vrot.slane %v3276_v43, 4 }
 0x1ce   : > { %v3308_v60 = vmax.f32 %v702_v45, %v2398_v58  ;;  %v3314_v61 = vmax.f32 %v703_v49, %v2399_v59  ;;  %v3324_v1 = vmax.f32 %v704_v52, %v2400_v62  ;;  %v3330_v2 = vmax.f32 %v705_v53, %v2401_v63  ;;  %2650 = vmatprep.subr.bf16.mxu1 %v2649_v18 }
 0x1cf   : > { %974 = vrot.lane.b32.xlu1 %v3278_v44, %s3016_s15  ;;  %972 = vrot.lane.b32.xlu0 %v3276_v43, %s3016_s15  ;;  %v1244_v26 = vrot.slane %v3276_v43, 6  ;;  %v850_v27 = vrot.slane %v3292_v56, 2  ;;  %v1066_v28 = vrot.slane %v3292_v56, 4  ;;  %v1246_v29 = vrot.slane %v3292_v56, 6 }
 0x1d0   : > { %v851_v30 = vrot.slane %v3298_v57, 2  ;;  %v1067_v31 = vrot.slane %v3298_v57, 4  ;;  %v1247_v32 = vrot.slane %v3298_v57, 6  ;;  %v852_v33 = vrot.slane %v3308_v60, 2 }
 0x1d1   : > { %v1068_v34 = vrot.slane %v3308_v60, 4  ;;  %v1248_v35 = vrot.slane %v3308_v60, 6  ;;  %v853_v36 = vrot.slane %v3314_v61, 2  ;;  %v1069_v37 = vrot.slane %v3314_v61, 4 }
 0x1d2   : > { %v1249_v38 = vrot.slane %v3314_v61, 6  ;;  %v854_v39 = vrot.slane %v3324_v1, 2  ;;  %v1070_v40 = vrot.slane %v3324_v1, 4  ;;  %v1250_v41 = vrot.slane %v3324_v1, 6 }
 0x1d3   : > { %756 = vrot.lane.b32.xlu1 %v3278_v44, %s3019_s12  ;;  %754 = vrot.lane.b32.xlu0 %v3276_v43, %s3019_s12  ;;  %v855_v15 = vrot.slane %v3330_v2, 2  ;;  %v1071_v16 = vrot.slane %v3330_v2, 4 }
 0x1d7   : > { %976 = vrot.lane.b32.xlu1 %v3292_v56, %s3016_s15  ;;  %944 = vrot.lane.b32.xlu0 %v3292_v56, %s3018_s30 }
 0x1db   : > { %946 = vrot.lane.b32.xlu1 %v3298_v57, %s3018_s30  ;;  %758 = vrot.lane.b32.xlu0 %v3292_v56, %s3019_s12 }
 0x1df   : > { %760 = vrot.lane.b32.xlu1 %v3298_v57, %s3019_s12  ;;  %978 = vrot.lane.b32.xlu0 %v3298_v57, %s3016_s15 }
 0x1e3   : > { %980 = vrot.lane.b32.xlu1 %v3308_v60, %s3016_s15  ;;  %948 = vrot.lane.b32.xlu0 %v3308_v60, %s3018_s30 }
 0x1e7   : > { %950 = vrot.lane.b32.xlu1 %v3314_v61, %s3018_s30  ;;  %762 = vrot.lane.b32.xlu0 %v3308_v60, %s3019_s12 }
 0x1eb   : > { %764 = vrot.lane.b32.xlu1 %v3314_v61, %s3019_s12  ;;  %982 = vrot.lane.b32.xlu0 %v3314_v61, %s3016_s15 }
 0x1ef   : > { %984 = vrot.lane.b32.xlu1 %v3324_v1, %s3016_s15  ;;  %952 = vrot.lane.b32.xlu0 %v3324_v1, %s3018_s30 }
 0x1f3   : > { %954 = vrot.lane.b32.xlu1 %v3330_v2, %s3018_s30  ;;  %766 = vrot.lane.b32.xlu0 %v3324_v1, %s3019_s12 }
 0x1f7   : > { %768 = vrot.lane.b32.xlu1 %v3330_v2, %s3019_s12  ;;  %986 = vrot.lane.b32.xlu0 %v3330_v2, %s3016_s15 }
 0x23d   : > { %v943_v24 = vpop.permute.xlu1 %942  ;;  %v941_v25 = vpop.permute.xlu0 %940 }
 0x23e   : > { %v957_v42 = vrot.slane %v943_v24, 2  ;;  %v1154_v45 = vrot.slane %v943_v24, 4  ;;  %v1336_v49 = vrot.slane %v943_v24, 6  ;;  %v956_v52 = vrot.slane %v941_v25, 2 }
 0x23f   : > { %v1153_v63 = vrot.slane %v941_v25, 4  ;;  %v1335_v3 = vrot.slane %v941_v25, 6 }
 0x241   : > { %v975_v53 = vpop.permute.xlu1 %974  ;;  %v973_v54 = vpop.permute.xlu0 %972 }
 0x242   : > { %v989_v55 = vrot.slane %v975_v53, 2  ;;  %v1170_v58 = vrot.slane %v975_v53, 4  ;;  %v1352_v59 = vrot.slane %v975_v53, 6  ;;  %v988_v62 = vrot.slane %v973_v54, 2 }
 0x243   : > { %v1169_v4 = vrot.slane %v973_v54, 4  ;;  %v1351_v5 = vrot.slane %v973_v54, 6 }
 0x244   : > { %v1005_v7 = vmax.f32 %v957_v42, %v989_v55  ;;  %v1186_v8 = vmax.f32 %v1154_v45, %v1170_v58  ;;  %v1368_v9 = vmax.f32 %v1336_v49, %v1352_v59  ;;  %v1004_v10 = vmax.f32 %v956_v52, %v988_v62 }
 0x245   : > { %v1185_v11 = vmax.f32 %v1153_v63, %v1169_v4  ;;  %v1367_v12 = vmax.f32 %v1335_v3, %v1351_v5  ;;  %v757_v13 = vpop.permute.xlu1 %756  ;;  %v755_v14 = vpop.permute.xlu0 %754  ;;  %v1251_v58 = vrot.slane %v3330_v2, 6 }
 0x246   : > { %v1027_v17 = vrot.slane %v1005_v7, %v3250_v47  ;;  %v1208_v18 = vrot.slane %v1186_v8, %v3250_v47  ;;  %v1390_v24 = vrot.slane %v1368_v9, %v3250_v47  ;;  %v1023_v25 = vrot.slane %v1004_v10, %v3250_v47 }
 0x247   : > { %v1204_v42 = vrot.slane %v1185_v11, %v3250_v47  ;;  %v1386_v45 = vrot.slane %v1367_v12, %v3250_v47  ;;  %v779_v49 = vmax.f32 %v3278_v44, %v757_v13  ;;  %v865_v52 = vrot.slane %v757_v13, 2 }
 0x248   : > { %v1081_v53 = vrot.slane %v757_v13, 4  ;;  %v1261_v54 = vrot.slane %v757_v13, 6  ;;  %v778_v55 = vmax.f32 %v3276_v43, %v755_v14  ;;  %v1052_v59 = vsel %vm826_vm6, %v1027_v17, %v1023_v25 }
 0x249   : > { %v1233_v62 = vsel %vm826_vm6, %v1208_v18, %v1204_v42  ;;  %v1415_v63 = vsel %vm826_vm6, %v1390_v24, %v1386_v45  ;;  %v881_v3 = vmax.f32 %v849_v19, %v865_v52  ;;  %v977_v4 = vpop.permute.xlu1 %976  ;;  %v945_v5 = vpop.permute.xlu0 %944  ;;  %v801_v7 = vrot.slane %v779_v49, %v3250_v47 }
 0x24a   : > { %v1097_v8 = vmax.f32 %v1065_v20, %v1081_v53  ;;  %v1277_v9 = vmax.f32 %v1245_v21, %v1261_v54  ;;  %v864_v10 = vrot.slane %v755_v14, 2  ;;  %v797_v12 = vrot.slane %v778_v55, %v3250_v47 }
 0x24b   : > { %v903_v11 = vrot.slane %v881_v3, %v3250_v47  ;;  %v1080_v13 = vrot.slane %v755_v14, 4  ;;  %v1260_v17 = vrot.slane %v755_v14, 6  ;;  %v990_v25 = vrot.slane %v977_v4, 2 }
 0x24c   : > { %v1119_v19 = vrot.slane %v1097_v8, %v3250_v47  ;;  %v1299_v18 = vrot.slane %v1277_v9, %v3250_v47  ;;  %v880_v24 = vmax.f32 %v848_v22, %v864_v10  ;;  %v1171_v21 = vrot.slane %v977_v4, 4 }
 0x24d   : > { %v1096_v20 = vmax.f32 %v1064_v23, %v1080_v13  ;;  %v1276_v44 = vmax.f32 %v1244_v26, %v1260_v17  ;;  %v1353_v42 = vrot.slane %v977_v4, 6  ;;  %v947_v45 = vpop.permute.xlu1 %946  ;;  %v759_v49 = vpop.permute.xlu0 %758  ;;  %v958_v52 = vrot.slane %v945_v5, 2 }
 0x24e   : > { %v899_v14 = vrot.slane %v880_v24, %v3250_v47  ;;  %v1155_v53 = vrot.slane %v945_v5, 4  ;;  %v1337_v54 = vrot.slane %v945_v5, 6  ;;  %v827_v55 = vsel %vm826_vm6, %v801_v7, %v797_v12 }
 0x24f   : > { %v1115_v22 = vrot.slane %v1096_v20, %v3250_v47  ;;  %v1295_v3 = vrot.slane %v1276_v44, %v3250_v47  ;;  %v959_v8 = vrot.slane %v947_v45, 2  ;;  %v1006_v23 = vmax.f32 %v958_v52, %v990_v25 }
 0x250   : > { %v1187_v9 = vmax.f32 %v1155_v53, %v1171_v21  ;;  %v1369_v43 = vmax.f32 %v1337_v54, %v1353_v42  ;;  %v1156_v26 = vrot.slane %v947_v45, 4  ;;  %v3427_v4 = vsel %vm826_vm6, %v903_v11, %v899_v14 }
 0x251   : > { %v1144_v10 = vsel %vm826_vm6, %v1119_v19, %v1115_v22  ;;  %v3431_v13 = vsel %vm826_vm6, %v1299_v18, %v1295_v3  ;;  %v780_v5 = vmax.f32 %v3292_v56, %v759_v49  ;;  %v761_v7 = vpop.permute.xlu1 %760  ;;  %v979_v12 = vpop.permute.xlu0 %978  ;;  %v1031_v17 = vrot.slane %v1006_v23, %v3250_v47 }
 0x252   : > { %v1212_v24 = vrot.slane %v1187_v9, %v3250_v47  ;;  %v1394_v25 = vrot.slane %v1369_v43, %v3250_v47  ;;  %v866_v20 = vrot.slane %v759_v49, 2  ;;  %v1082_v11 = vrot.slane %v759_v49, 4 }
 0x253   : > { %v805_v44 = vrot.slane %v780_v5, %v3250_v47  ;;  %v1262_v21 = vrot.slane %v759_v49, 6  ;;  %v781_v19 = vmax.f32 %v3298_v57, %v761_v7  ;;  %v3440_v18 = vsel %vm828_vm7, %v1031_v17, %v1052_v59 }
 0x254   : > { %v3443_v42 = vsel %vm828_vm7, %v1212_v24, %v1233_v62  ;;  %v1338_v14 = vrot.slane %v947_v45, 6  ;;  %v3447_v52 = vmax.f32 %v850_v27, %v866_v20  ;;  %v3450_v53 = vsel %vm828_vm7, %v1394_v25, %v1415_v63 }
 0x255   : > { %v3453_v54 = vsel %vm828_vm7, %v805_v44, %v827_v55  ;;  %v1098_v49 = vmax.f32 %v1066_v28, %v1082_v11  ;;  %v3459_v59 = vmax.f32 %v1246_v29, %v1262_v21  ;;  %v981_v62 = vpop.permute.xlu1 %980  ;;  %v949_v22 = vpop.permute.xlu0 %948  ;;  %v3462_v45 = vrot.slane %v781_v19, %v3250_v47 }
 0x256   : > { %v867_v27 = vrot.slane %v761_v7, 2  ;;  %v1083_v3 = vrot.slane %v761_v7, 4  ;;  %v1263_v23 = vrot.slane %v761_v7, 6  ;;  %v991_v9 = vrot.slane %v979_v12, 2 }
 0x257   : > { %v1123_v55 = vrot.slane %v1098_v49, %v3250_v47  ;;  %v1172_v43 = vrot.slane %v979_v12, 4  ;;  %v1354_v5 = vrot.slane %v979_v12, 6  ;;  %v1355_v11 = vrot.slane %v981_v62, 6 }
 0x258   : > { %v3469_v56 = vmax.f32 %v851_v30, %v867_v27  ;;  %v1099_v28 = vmax.f32 %v1067_v31, %v1083_v3  ;;  %v3475_v29 = vmax.f32 %v1247_v32, %v1263_v23  ;;  %v3480_v24 = vmax.f32 %v959_v8, %v991_v9 }
 0x259   : > { %v1145_v7 = vsel %vm828_vm7, %v1123_v55, %v1144_v10  ;;  %v3482_v25 = vmax.f32 %v1156_v26, %v1172_v43  ;;  %v951_v20 = vpop.permute.xlu1 %950  ;;  %v763_v30 = vpop.permute.xlu0 %762  ;;  %v3487_v57 = vmax.f32 %v1338_v14, %v1354_v5  ;;  %v992_v32 = vrot.slane %v981_v62, 2 }
 0x25a   : > { %v1127_v31 = vrot.slane %v1099_v28, %v3250_v47  ;;  %v1173_v8 = vrot.slane %v981_v62, 4  ;;  %v960_v19 = vrot.slane %v949_v22, 2  ;;  %v1157_v49 = vrot.slane %v949_v22, 4 }
 0x25b   : > { %v1216_v21 = vrot.slane %v3482_v25, %v3250_v47  ;;  %v1339_v27 = vrot.slane %v949_v22, 6  ;;  %v961_v3 = vrot.slane %v951_v20, 2  ;;  %v1158_v23 = vrot.slane %v951_v20, 4 }
 0x25c   : > { %v1146_v26 = vsel %vm830_vm8, %v1127_v31, %v1145_v7  ;;  %v3498_v43 = vmax.f32 %v960_v19, %v992_v32  ;;  %v3500_v28 = vmax.f32 %v1157_v49, %v1173_v8  ;;  %v782_v62 = vmax.f32 %v3308_v60, %v763_v30 }
 0x25d   : > { %v765_v55 = vpop.permute.xlu1 %764  ;;  %v983_v9 = vpop.permute.xlu0 %982  ;;  %v868_v5 = vrot.slane %v763_v30, 2  ;;  %v3503_v7 = vmax.f32 %v1339_v27, %v1355_v11  ;;  %v1084_v31 = vrot.slane %v763_v30, 4  ;;  %v1264_v51 = vrot.slane %v763_v30, 6 }
 0x25e   : > { %v783_v48 = vmax.f32 %v3314_v61, %v765_v55  ;;  %v1340_v0 = vrot.slane %v951_v20, 6  ;;  %v3517_v11 = vrot.slane %v782_v62, %v3250_v47  ;;  %v1265_v14 = vrot.slane %v765_v55, 6 }
 0x25f   : > { %v3512_v32 = vmax.f32 %v852_v33, %v868_v5  ;;  %v1100_v30 = vmax.f32 %v1068_v34, %v1084_v31  ;;  %v3523_v19 = vmax.f32 %v1248_v35, %v1264_v51  ;;  %v869_v33 = vrot.slane %v765_v55, 2 }
 0x260   : > { %v3526_v20 = vrot.slane %v783_v48, %v3250_v47  ;;  %v1085_v5 = vrot.slane %v765_v55, 4  ;;  %v993_v22 = vrot.slane %v983_v9, 2  ;;  %v1174_v12 = vrot.slane %v983_v9, 4 }
 0x261   : > { %v985_v49 = vpop.permute.xlu1 %984  ;;  %v953_v27 = vpop.permute.xlu0 %952  ;;  %v1131_v62 = vrot.slane %v1100_v30, %v3250_v47  ;;  %v3533_v60 = vmax.f32 %v853_v36, %v869_v33  ;;  %v3541_v48 = vmax.f32 %v1249_v38, %v1265_v14  ;;  %v1356_v34 = vrot.slane %v983_v9, 6 }
 0x262   : > { %v3537_v51 = vmax.f32 %v1069_v37, %v1085_v5  ;;  %v3548_v31 = vmax.f32 %v961_v3, %v993_v22  ;;  %v3550_v30 = vmax.f32 %v1158_v23, %v1174_v12  ;;  %v994_v14 = vrot.slane %v985_v49, 2 }
 0x263   : > { %v3544_v35 = vsel %vm832_vm9, %v1131_v62, %v1146_v26  ;;  %v3556_v38 = vmax.f32 %v1340_v0, %v1356_v34  ;;  %v1175_v9 = vrot.slane %v985_v49, 4  ;;  %v1357_v12 = vrot.slane %v985_v49, 6 }
 0x264   : > { %v1224_v23 = vrot.slane %v3550_v30, %v3250_v47  ;;  %v962_v22 = vrot.slane %v953_v27, 2  ;;  %v1159_v5 = vrot.slane %v953_v27, 4  ;;  %v1341_v62 = vrot.slane %v953_v27, 6 }
 0x265   : > { %v955_v36 = vpop.permute.xlu1 %954  ;;  %v767_v33 = vpop.permute.xlu0 %766 }
 0x266   : > { %v963_v34 = vrot.slane %v955_v36, 2  ;;  %v1160_v61 = vrot.slane %v955_v36, 4  ;;  %v784_v55 = vmax.f32 %v3324_v1, %v767_v33  ;;  %v3567_v10 = vmax.f32 %v962_v22, %v994_v14 }
 0x267   : > { %v1191_v3 = vmax.f32 %v1159_v5, %v1175_v9  ;;  %v3569_v49 = vmax.f32 %v1341_v62, %v1357_v12  ;;  %v870_v37 = vrot.slane %v767_v33, 2  ;;  %v1342_v30 = vrot.slane %v955_v36, 6 }
 0x268   : > { %v821_v27 = vrot.slane %v784_v55, %v3250_v47  ;;  %v1086_v17 = vrot.slane %v767_v33, 4  ;;  %v1266_v8 = vrot.slane %v767_v33, 6 }
 0x269   : > { %v769_v26 = vpop.permute.xlu1 %768  ;;  %v987_v44 = vpop.permute.xlu0 %986  ;;  %v1228_v63 = vrot.slane %v1191_v3, %v3250_v47  ;;  %v886_v12 = vmax.f32 %v854_v39, %v870_v37 }
 0x26a   : > { %v785_v9 = vmax.f32 %v3330_v2, %v769_v26  ;;  %v3582_v55 = vmax.f32 %v1070_v40, %v1086_v17  ;;  %v871_v36 = vrot.slane %v769_v26, 2  ;;  %v1087_v33 = vrot.slane %v769_v26, 4 }
 0x26b   : > { %v1267_v22 = vrot.slane %v769_v26, 6  ;;  %v995_v5 = vrot.slane %v987_v44, 2  ;;  %v1176_v62 = vrot.slane %v987_v44, 4  ;;  %v1358_v0 = vrot.slane %v987_v44, 6 }
 0x26c   : > { %v1139_v3 = vrot.slane %v3582_v55, %v3250_v47  ;;  %v1282_v14 = vmax.f32 %v1250_v41, %v1266_v8  ;;  %v887_v50 = vmax.f32 %v855_v15, %v871_v36  ;;  %v3592_v39 = vmax.f32 %v1071_v16, %v1087_v33  ;;  %v1491_v36 = vld [vmem:[%s4234_s3 + $0x118] sm:$0xff] }
 0x26d   : > { %v1283_v40 = vmax.f32 %v1251_v58, %v1267_v22  ;;  %v3596_v17 = vmax.f32 %v963_v34, %v995_v5  ;;  %v1192_v37 = vmax.f32 %v1160_v61, %v1176_v62  ;;  %v825_v44 = vrot.slane %v785_v9, %v3250_v47 }
 0x26e   : > { %v1143_v26 = vrot.slane %v3592_v39, %v3250_v47  ;;  %v3601_v1 = vmax.f32 %v1342_v30, %v1358_v0  ;;  %v831_v41 = vsel %vm830_vm8, %v3462_v45, %v3453_v54  ;;  %v1235_v2 = vsel %vm830_vm8, %v1216_v21, %v3443_v42  ;;  %v1480_v39 = vld [vmem:[%s4234_s3 + $0xc0] sm:$0xff] }
 0x26f   : > { %v833_v15 = vsel %vm832_vm9, %v3517_v11, %v831_v41  ;;  %v1232_v16 = vrot.slane %v1192_v37, %v3250_v47  ;;  %v4257_v58 = vrot.slane %v3500_v28, %v3250_v47  ;;  %v923_v61 = vrot.slane %v886_v12, %v3250_v47  ;;  %v1490_v12 = vld [vmem:[%s4234_s3 + $0x110] sm:$0xff]  ;;  %v1459_v37 = vld [vmem:[%s4234_s3 + $0x18] sm:$0xff] }
 0x270   : > { %v835_v54 = vsel %vm834_vm10, %v3526_v20, %v833_v15  ;;  %v927_v25 = vrot.slane %v887_v50, %v3250_v47  ;;  %v4258_v42 = vrot.slane %v3447_v52, %v3250_v47  ;;  %v4259_v0 = vrot.slane %v3469_v56, %v3250_v47  ;;  %v1474_v56 = vld [vmem:[%s4234_s3 + $0x90] sm:$0xff]  ;;  %v1509_v15 = vld [vmem:[%s4234_s3 + $0x1a8] sm:$0xff] }
 0x271   : > { %v1236_v8 = vsel %vm832_vm9, %v4257_v58, %v1235_v2  ;;  %v837_v11 = vsel %vm836_vm11, %v821_v27, %v835_v54  ;;  %v1319_v20 = vrot.slane %v1282_v14, %v3250_v47  ;;  %v4260_v52 = vrot.slane %v3512_v32, %v3250_v47  ;;  %v1475_v27 = vld [vmem:[%s4234_s3 + $0x98] sm:$0xff] }
 0x272   : > { %v1237_v45 = vsel %vm834_vm10, %v1224_v23, %v1236_v8  ;;  %v929_v21 = vsel %vm828_vm7, %v4258_v42, %v3427_v4  ;;  %v839_v23 = vsel %vm838_vm12, %v825_v44, %v837_v11  ;;  %v4262_v32 = vrot.slane %v3533_v60, %v3250_v47 }
 0x273   : > { %v1238_v28 = vsel %vm836_vm11, %v1228_v63, %v1237_v45  ;;  %v930_v34 = vsel %vm830_vm8, %v4259_v0, %v929_v21  ;;  %v4261_v63 = vrot.slane %v3459_v59, %v3250_v47  ;;  %843 = vrot.lane.b32.xlu1 %v839_v23, %s3019_s12  ;;  %842 = vst.msk [vmem:[#allocation3] sm:$0xff] %vm841_vm13, %v839_v23  ;;  %v1492_v45 = vld [vmem:[%s4234_s3 + $0x120] sm:$0xff]  ;;  %v1461_v0 = vld [vmem:[%s4234_s3 + $0x28] sm:$0xff] }
 0x274   : > { %v1239_v50 = vsel %vm838_vm12, %v1232_v16, %v1238_v28  ;;  %v931_v4 = vsel %vm832_vm9, %v4260_v52, %v930_v34  ;;  %v4263_v14 = vrot.slane %v3475_v29, %v3250_v47  ;;  %v4264_v60 = vrot.slane %v3523_v19, %v3250_v47  ;;  %v1508_v19 = vld [vmem:[%s4234_s3 + $0x1a0] sm:$0xff]  ;;  %v1510_v34 = vld [vmem:[%s4234_s3 + $0x1b0] sm:$0xff] }
 0x275   : > { %v1325_v30 = vsel %vm828_vm7, %v4261_v63, %v3431_v13  ;;  %1240 = vrot.lane.b32.xlu0 %v1239_v50, %s3016_s15  ;;  %v932_v59 = vsel %vm834_vm10, %v4262_v32, %v931_v4  ;;  %v1323_v13 = vrot.slane %v1283_v40, %v3250_v47  ;;  %v1051_v29 = vrot.slane %v3596_v17, %v3250_v47  ;;  %v1458_v40 = vld [vmem:[%s4234_s3 + $0x10] sm:$0xff]  ;;  %v1476_v16 = vld [vmem:[%s4234_s3 + $0xa0] sm:$0xff]  ;;  %v1479_v4 = vld [vmem:[%s4234_s3 + $0xb8] sm:$0xff] }
 0x276   : > { %v1326_v9 = vsel %vm830_vm8, %v4263_v14, %v1325_v30  ;;  %v933_v33 = vsel %vm836_vm11, %v923_v61, %v932_v59  ;;  %v4265_v5 = vrot.slane %v3480_v24, %v3250_v47  ;;  %v4266_v44 = vrot.slane %v3541_v48, %v3250_v47  ;;  %v1477_v48 = vld [vmem:[%s4234_s3 + $0xa8] sm:$0xff]  ;;  %v1478_v52 = vld [vmem:[%s4234_s3 + $0xb0] sm:$0xff] }
 0x277   : > { %v1327_v22 = vsel %vm832_vm9, %v4264_v60, %v1326_v9  ;;  %v934_v17 = vsel %vm838_vm12, %v927_v25, %v933_v33  ;;  %v1414_v2 = vrot.slane %v3601_v1, %v3250_v47  ;;  %v4269_v1 = vrot.slane %v3487_v57, %v3250_v47  ;;  %v1493_v25 = vld [vmem:[%s4234_s3 + $0x128] sm:$0xff]  ;;  %v1494_v9 = vld [vmem:[%s4234_s3 + $0x130] sm:$0xff]  ;;  %v1512_v33 = vld [vmem:[%s4234_s3 + $0x1c0] sm:$0xff] }
 0x278   : > { %v1054_v62 = vsel %vm830_vm8, %v4265_v5, %v3440_v18  ;;  %v1328_v24 = vsel %vm834_vm10, %v4266_v44, %v1327_v22  ;;  %v4267_v18 = vrot.slane %v3498_v43, %v3250_v47  ;;  %v4268_v43 = vrot.slane %v3548_v31, %v3250_v47  ;;  %v1460_v31 = vld [vmem:[%s4234_s3 + $0x20] sm:$0xff]  ;;  %935 = vrot.lane.b32.xlu1 %v934_v17, %s3018_s30  ;;  %v1513_v60 = vld [vmem:[%s4234_s3 + $0x1c8] sm:$0xff]  ;;  %v1514_v44 = vld [vmem:[%s4234_s3 + $0x1d0] sm:$0xff] }
 0x279   : > { %v1329_v58 = vsel %vm836_vm11, %v1319_v20, %v1328_v24  ;;  %v1417_v61 = vsel %vm830_vm8, %v4269_v1, %v3450_v53  ;;  %v2617_v54 = vpack.c.bf16 %v1475_v27, %v1474_v56  ;;  %v4270_v53 = vrot.slane %v3567_v10, %v3250_v47  ;;  %v1511_v10 = vld [vmem:[%s4234_s3 + $0x1b8] sm:$0xff]  ;;  %v1465_v17 = vld [vmem:[%s4234_s3 + $0x48] sm:$0xff] }
 0x27a   : > { %v1055_v41 = vsel %vm832_vm9, %v4267_v18, %v1054_v62  ;;  %v1330_v42 = vsel %vm838_vm12, %v1323_v13, %v1329_v58  ;;  %v4271_v21 = vrot.slane %v3503_v7, %v3250_v47  ;;  %v2651_v28 = vpack.c.bf16 %v1491_v36, %v1490_v12  ;;  %v1463_v36 = vld [vmem:[%s4234_s3 + $0x38] sm:$0xff]  ;;  %v1496_v62 = vld [vmem:[%s4234_s3 + $0x140] sm:$0xff]  ;;  %v1482_v18 = vld [vmem:[%s4234_s3 + $0xd0] sm:$0xff] }
 0x27b   : > { %v1056_v8 = vsel %vm834_vm10, %v4268_v43, %v1055_v41  ;;  %1331 = vrot.lane.b32.xlu0 %v1330_v42, %s3018_s30  ;;  %v4272_v7 = vrot.slane %v3556_v38, %v3250_v47  ;;  %2618 = vmatprep.subr.bf16.mxu0 %v2617_v54  ;;  %v2619_v50 = vpack.c.bf16 %v1459_v37, %v1458_v40  ;;  %v1497_v40 = vld [vmem:[%s4234_s3 + $0x148] sm:$0xff]  ;;  %v1464_v37 = vld [vmem:[%s4234_s3 + $0x40] sm:$0xff]  ;;  %v1515_v24 = vld [vmem:[%s4234_s3 + $0x1d8] sm:$0xff] }
 0x27c   : > { %v1057_v57 = vsel %vm836_vm11, %v4270_v53, %v1056_v8  ;;  %v1418_v11 = vsel %vm832_vm9, %v4271_v21, %v1417_v61  ;;  %v4273_v63 = vrot.slane %v3569_v49, %v3250_v47  ;;  %2652 = vmatpush3.bf16.msra.mxu1 %v2651_v28  ;;  %v4274_v38 = vrot.slane %v3537_v51, %v3250_v47  ;;  %v1495_v51 = vld [vmem:[%s4234_s3 + $0x138] sm:$0xff]  ;;  %v1466_v43 = vld [vmem:[%s4234_s3 + $0x50] sm:$0xff]  ;;  %v1516_v61 = vld [vmem:[%s4234_s3 + $0x1e0] sm:$0xff] }
 0x27d   : > { %v1058_v20 = vsel %vm838_vm12, %v1051_v29, %v1057_v57  ;;  %v1419_v23 = vsel %vm834_vm10, %v4272_v7, %v1418_v11  ;;  %v2653_v27 = vpack.c.bf16 %v1509_v15, %v1508_v19  ;;  %v2621_v32 = vpack.c.bf16 %v1477_v48, %v1476_v16  ;;  %2620 = vmatpush3.bf16.msra.mxu0 %v2619_v50  ;;  %v1483_v41 = vld [vmem:[%s4234_s3 + $0xd8] sm:$0xff]  ;;  %v1498_v48 = vld [vmem:[%s4234_s3 + $0x150] sm:$0xff]  ;;  %v1517_v54 = vld [vmem:[%s4234_s3 + $0x1e8] sm:$0xff] }
 0x27e   : > { %v1420_v30 = vsel %vm836_vm11, %v4273_v63, %v1419_v23  ;;  %v1148_v56 = vsel %vm834_vm10, %v4274_v38, %v3544_v35  ;;  %v2655_v13 = vpack.c.bf16 %v1493_v25, %v1492_v45  ;;  %v2623_v14 = vpack.c.bf16 %v1461_v0, %v1460_v31  ;;  %v1462_v35 = vld [vmem:[%s4234_s3 + $0x30] sm:$0xff]  ;;  %1059 = vrot.lane.b32.xlu1 %v1058_v20, %s3019_s12  ;;  %v1499_v58 = vld [vmem:[%s4234_s3 + $0x158] sm:$0xff]  ;;  %v1484_v45 = vld [vmem:[%s4234_s3 + $0xe0] sm:$0xff] }
 0x27f   : > { %v1149_v59 = vsel %vm836_vm11, %v1139_v3, %v1148_v56  ;;  %v2657_v49 = vpack.c.bf16 %v1511_v10, %v1510_v34  ;;  %v1421_v55 = vsel %vm838_vm12, %v1414_v2, %v1420_v30  ;;  %2654 = vmatprep.subr.bf16.mxu1 %v2653_v27  ;;  %v2625_v12 = vpack.c.bf16 %v1479_v4, %v1478_v52  ;;  %v1467_v1 = vld [vmem:[%s4234_s3 + $0x58] sm:$0xff]  ;;  %v1485_v25 = vld [vmem:[%s4234_s3 + $0xe8] sm:$0xff]  ;;  %v1500_v57 = vld [vmem:[%s4234_s3 + $0x160] sm:$0xff] }
 0x280   : > { %v1150_v3 = vsel %vm838_vm12, %v1143_v26, %v1149_v59  ;;  %1422 = vrot.lane.b32.xlu0 %v1421_v55, %s3019_s12  ;;  %2622 = vmatprep.subr.bf16.mxu0 %v2621_v32  ;;  %v1481_v26 = vld [vmem:[%s4234_s3 + $0xc8] sm:$0xff]  ;;  %v2659_v22 = vpack.c.bf16 %v1495_v51, %v1494_v9  ;;  %v2627_v29 = vpack.c.bf16 %v1463_v36, %v1462_v35  ;;  %v1468_v11 = vld [vmem:[%s4234_s3 + $0x60] sm:$0xff]  ;;  %v1518_v34 = vld [vmem:[%s4234_s3 + $0x1f0] sm:$0xff] }
 0x281   : > { %1152 = vst.msk [vmem:[#allocation3 + $0x8] sm:$0xff] %vm841_vm13, %v1150_v3  ;;  %2656 = vmatpush3.bf16.msra.mxu1 %v2655_v13  ;;  %2624 = vmatpush3.bf16.msra.mxu0 %v2623_v14  ;;  %v2661_v5 = vpack.c.bf16 %v1513_v60, %v1512_v33  ;;  %v2629_v19 = vpack.c.bf16 %v1481_v26, %v1480_v39  ;;  %v1501_v21 = vld [vmem:[%s4234_s3 + $0x168] sm:$0xff]  ;;  %v1519_v10 = vld [vmem:[%s4234_s3 + $0x1f8] sm:$0xff]  ;;  %v1486_v20 = vld [vmem:[%s4234_s3 + $0xf0] sm:$0xff] }
 0x282   : > { %2658 = vmatprep.subr.bf16.mxu1 %v2657_v49  ;;  %2626 = vmatprep.subr.bf16.mxu0 %v2625_v12  ;;  %v2663_v2 = vpack.c.bf16 %v1497_v40, %v1496_v62  ;;  %v2631_v15 = vpack.c.bf16 %v1465_v17, %v1464_v37  ;;  %v2665_v16 = vpack.c.bf16 %v1515_v24, %v1514_v44  ;;  %v1469_v0 = vld [vmem:[%s4234_s3 + $0x68] sm:$0xff]  ;;  %v1487_v7 = vld [vmem:[%s4234_s3 + $0xf8] sm:$0xff]  ;;  %v1502_v4 = vld [vmem:[%s4234_s3 + $0x170] sm:$0xff] }
 0x283   : > { %v2633_v8 = vpack.c.bf16 %v1483_v41, %v1482_v18  ;;  %v2667_v31 = vpack.c.bf16 %v1499_v58, %v1498_v48  ;;  %v2635_v42 = vpack.c.bf16 %v1467_v1, %v1466_v43  ;;  %v2669_v53 = vpack.c.bf16 %v1517_v54, %v1516_v61  ;;  %v1503_v63 = vld [vmem:[%s4234_s3 + $0x178] sm:$0xff]  ;;  %v1470_v38 = vld [vmem:[%s4234_s3 + $0x70] sm:$0xff]  ;;  %v1536_v27 = vld [vmem:[%s4234_s3 + $0x280] sm:$0xff] }
 0x284   : > { %v2637_v28 = vpack.c.bf16 %v1485_v25, %v1484_v45  ;;  %v2671_v23 = vpack.c.bf16 %v1501_v21, %v1500_v57  ;;  %v2639_v50 = vpack.c.bf16 %v1469_v0, %v1468_v11  ;;  %v2673_v52 = vpack.c.bf16 %v1519_v10, %v1518_v34  ;;  %v1471_v56 = vld [vmem:[%s4234_s3 + $0x78] sm:$0xff]  ;;  %v1537_v32 = vld [vmem:[%s4234_s3 + $0x288] sm:$0xff]  ;;  %v1538_v62 = vld [vmem:[%s4234_s3 + $0x290] sm:$0xff] }
 0x285   : > { %2660 = vmatpush3.bf16.msra.mxu1 %v2659_v22  ;;  %2628 = vmatpush3.bf16.msra.mxu0 %v2627_v29  ;;  %v2641_v30 = vpack.c.bf16 %v1487_v7, %v1486_v20  ;;  %v2675_v59 = vpack.c.bf16 %v1503_v63, %v1502_v4  ;;  %v2643_v13 = vpack.c.bf16 %v1471_v56, %v1470_v38  ;;  %v4275_v22 = vmov 0.0   ;;  %v1520_v29 = vld [vmem:[%s4234_s3 + $0x200] sm:$0xff]  ;;  %v1539_v40 = vld [vmem:[%s4234_s3 + $0x298] sm:$0xff]  ;;  %v1522_v44 = vld [vmem:[%s4234_s3 + $0x210] sm:$0xff] }
 0x286   : > { %2662 = vmatprep.subr.bf16.mxu1 %v2661_v5  ;;  %2630 = vmatprep.subr.bf16.mxu0 %v2629_v19  ;;  %v2677_v14 = vpack.c.bf16 %v1537_v32, %v1536_v27  ;;  %v1521_v5 = vld [vmem:[%s4234_s3 + $0x208] sm:$0xff]  ;;  %v2681_v17 = vpack.c.bf16 %v1539_v40, %v1538_v62  ;;  %v1523_v24 = vld [vmem:[%s4234_s3 + $0x218] sm:$0xff]  ;;  %v1540_v41 = vld [vmem:[%s4234_s3 + $0x2a0] sm:$0xff] }
 0x287   : > { %v2679_v37 = vpack.c.bf16 %v1521_v5, %v1520_v29  ;;  %v1524_v58 = vld [vmem:[%s4234_s3 + $0x220] sm:$0xff]  ;;  %v1525_v43 = vld [vmem:[%s4234_s3 + $0x228] sm:$0xff]  ;;  %v1543_v1 = vld [vmem:[%s4234_s3 + $0x2b8] sm:$0xff] }
 0x288   : > { %v2687_v61 = vpack.c.bf16 %v1525_v43, %v1524_v58  ;;  %v1526_v45 = vld [vmem:[%s4234_s3 + $0x230] sm:$0xff]  ;;  %v1527_v25 = vld [vmem:[%s4234_s3 + $0x238] sm:$0xff]  ;;  %v1528_v21 = vld [vmem:[%s4234_s3 + $0x240] sm:$0xff] }
 0x289   : > { %2664 = vmatpush3.bf16.msra.mxu1 %v2663_v2  ;;  %2632 = vmatpush3.bf16.msra.mxu0 %v2631_v15  ;;  %v1541_v2 = vld [vmem:[%s4234_s3 + $0x2a8] sm:$0xff]  ;;  %v1547_v0 = vld [vmem:[%s4234_s3 + $0x2d8] sm:$0xff]  ;;  %v1530_v20 = vld [vmem:[%s4234_s3 + $0x250] sm:$0xff] }
 0x28a   : > { %2666 = vmatprep.subr.bf16.mxu1 %v2665_v16  ;;  %2634 = vmatprep.subr.bf16.mxu0 %v2633_v8  ;;  %v2683_v16 = vpack.c.bf16 %v1523_v24, %v1522_v44  ;;  %v2685_v48 = vpack.c.bf16 %v1541_v2, %v1540_v41  ;;  %v1542_v8 = vld [vmem:[%s4234_s3 + $0x2b0] sm:$0xff]  ;;  %v1529_v11 = vld [vmem:[%s4234_s3 + $0x248] sm:$0xff]  ;;  %v1531_v7 = vld [vmem:[%s4234_s3 + $0x258] sm:$0xff] }
 0x28b   : > { %v2689_v54 = vpack.c.bf16 %v1543_v1, %v1542_v8  ;;  %v2695_v34 = vpack.c.bf16 %v1529_v11, %v1528_v21  ;;  %v1532_v63 = vld [vmem:[%s4234_s3 + $0x260] sm:$0xff]  ;;  %v1550_v38 = vld [vmem:[%s4234_s3 + $0x2f0] sm:$0xff]  ;;  %v1551_v56 = vld [vmem:[%s4234_s3 + $0x2f8] sm:$0xff] }
 0x28c   : > { %v2705_v32 = vpack.c.bf16 %v1551_v56, %v1550_v38  ;;  %v1871_v58 = vld [vmem:[#allocation10 + $0x8] sm:$0xff]  ;;  %v1870_v8 = vld [vmem:[#allocation10] sm:$0xff] }
 0x28d   : > { %2668 = vmatpush3.bf16.msra.mxu1 %v2667_v31  ;;  %2636 = vmatpush3.bf16.msra.mxu0 %v2635_v42  ;;  %v1544_v31 = vld [vmem:[%s4234_s3 + $0x2c0] sm:$0xff]  ;;  %v1545_v42 = vld [vmem:[%s4234_s3 + $0x2c8] sm:$0xff]  ;;  %v1898_v38 = vld [vmem:[#allocation10 + $0xe0] sm:$0xff] }
 0x28e   : > { %2670 = vmatprep.subr.bf16.mxu1 %v2669_v53  ;;  %2638 = vmatprep.subr.bf16.mxu0 %v2637_v28  ;;  %v2691_v53 = vpack.c.bf16 %v1527_v25, %v1526_v45  ;;  %v2693_v57 = vpack.c.bf16 %v1545_v42, %v1544_v31  ;;  %v1546_v28 = vld [vmem:[%s4234_s3 + $0x2d0] sm:$0xff]  ;;  %v1875_v43 = vld [vmem:[#allocation10 + $0x28] sm:$0xff] }
 0x28f   : > { %v2697_v10 = vpack.c.bf16 %v1547_v0, %v1546_v28  ;;  %v2709_v1 = vpack.c.bf16 %v1875_v43, %v1871_v58  ;;  %v1878_v42 = vld [vmem:[#allocation10 + $0x40] sm:$0xff]  ;;  %v1891_v28 = vld [vmem:[#allocation10 + $0xa8] sm:$0xff] }
 0x290   : > { %v2097_v58 = vld [vmem:[%s4238_s7 + $0xb8] sm:$0xff] }
 0x291   : > { %2672 = vmatpush3.bf16.msra.mxu1 %v2671_v23  ;;  %2640 = vmatpush3.bf16.msra.mxu0 %v2639_v50  ;;  %v1548_v23 = vld [vmem:[%s4234_s3 + $0x2e0] sm:$0xff]  ;;  %v1549_v50 = vld [vmem:[%s4234_s3 + $0x2e8] sm:$0xff] }
 0x292   : > { %2674 = vmatprep.subr.bf16.mxu1 %v2673_v52  ;;  %2642 = vmatprep.subr.bf16.mxu0 %v2641_v30  ;;  %v2699_v52 = vpack.c.bf16 %v1531_v7, %v1530_v20  ;;  %v2701_v4 = vpack.c.bf16 %v1549_v50, %v1548_v23  ;;  %v1533_v30 = vld [vmem:[%s4234_s3 + $0x268] sm:$0xff]  ;;  %v1886_v7 = vld [vmem:[#allocation10 + $0x80] sm:$0xff]  ;;  %v1895_v50 = vld [vmem:[#allocation10 + $0xc8] sm:$0xff] }
 0x293   : > { %v2703_v27 = vpack.c.bf16 %v1533_v30, %v1532_v63  ;;  %v1890_v23 = vld [vmem:[#allocation10 + $0xa0] sm:$0xff]  ;;  %v1899_v63 = vld [vmem:[#allocation10 + $0xe8] sm:$0xff] }
 0x294   : > { %v1894_v30 = vld [vmem:[#allocation10 + $0xc0] sm:$0xff] }
 0x295   : > { %2676 = vmatpush3.bf16.msra.mxu1 %v2675_v59  ;;  %2644 = vmatpush3.bf16.msra.mxu0 %v2643_v13  ;;  %v1534_v59 = vld [vmem:[%s4234_s3 + $0x270] sm:$0xff]  ;;  %v1535_v13 = vld [vmem:[%s4234_s3 + $0x278] sm:$0xff] }
 0x296   : > { %2678 = vmatprep.subr.bf16.mxu0 %v2677_v14  ;;  %v2707_v14 = vpack.c.bf16 %v1535_v13, %v1534_v59  ;;  %2710 = vmatprep.subr.bf16.mxu1 %v2709_v1  ;;  %v2721_v59 = vpack.c.bf16 %v1899_v63, %v1895_v50  ;;  %v1873_v13 = vld [vmem:[#allocation10 + $0x18] sm:$0xff]  ;;  %v1876_v63 = vld [vmem:[#allocation10 + $0x30] sm:$0xff] }
 0x297   : > { %v2080_v1 = vld [vmem:[%s4238_s7 + $0x30] sm:$0xff] }
 0x2e5   : > { %v844_v49 = vpop.permute.xlu1 %843 }
 0x2e6   : > { %847 = vst.msk [vmem:[#allocation3] sm:$0xff] %vm846_vm14, %v844_v49 }
 0x2e7   : > { %v1241_v9 = vpop.permute.xlu0 %1240 }
 0x2e8   : > { %1243 = vst.msk [vmem:[#allocation3 + $0x8] sm:$0xff] %vm846_vm14, %v1241_v9 }
 0x2ea   : > { %v936_v51 = vpop.permute.xlu1 %935 }
 0x2eb   : > { %939 = vst.msk [vmem:[#allocation3] sm:$0xff] %vm938_vm15, %v936_v51 }
 0x2ed   : > { %v1332_v35 = vpop.permute.xlu0 %1331 }
 0x2ee   : > { %1334 = vst.msk [vmem:[#allocation3 + $0x8] sm:$0xff] %vm938_vm15, %v1332_v35 }
 0x2f0   : > { %v1060_v55 = vpop.permute.xlu1 %1059 }
 0x2f1   : > { %1063 = vst.msk [vmem:[#allocation3] sm:$0xff] %vm1062_vm0, %v1060_v55 }
 0x2f2   : > { %v1423_v3 = vpop.permute.xlu0 %1422 }
 0x2f3   : > { %1425 = vst.msk [vmem:[#allocation3 + $0x8] sm:$0xff] %vm1062_vm0, %v1423_v3  ;;  %v2402_v3 = vld [vmem:[%s4235_s4] ss:$0 sm:$0xff] }
 0x2f8   : > { %v1426_v12 = vld [vmem:[#allocation3] sm:$0xff] }
 0x2f9   : > { %v1436_v36 = vrot.slane %v1426_v12, 7  ;;  %v1444_v33 = vrot.slane %v1426_v12, 1 }
 0x2fa   : > { %v1427_v60 = vld [vmem:[#allocation3 + $0x8] sm:$0xff] }
 0x2fb   : > { %v1437_v39 = vrot.slane %v1427_v60, 7  ;;  %v1445_v26 = vrot.slane %v1427_v60, 1  ;;  %1693 = vmatprep.mubr.f32.mxu1 %v1427_v60  ;;  %1440 = vst [vmem:[#allocation4] sm:$0xfe] %v1436_v36  ;;  %1448 = vst [vmem:[#allocation4 + $0x20] sm:$0x7f] %v1444_v33 }
 0x2fc   : > { %1694 = vmatmul.mubr.f32.vlgmr.msra.gmra.mrb[4].mxu1 %v1426_v12 }
 0x2fd   : > { %1441 = vst [vmem:[#allocation4 + $0x8] sm:$0xfe] %v1437_v39  ;;  %1449 = vst [vmem:[#allocation4 + $0x28] sm:$0x7f] %v1445_v26  ;;  %1992 = vmatprep.mubr.f32.mxu1 %v4275_v22 }
 0x302   : > { %v1450_v18 = vld [vmem:[#allocation4] sm:$0xff] }
 0x303   : > { %v1454_v49 = vld [vmem:[#allocation4 + $0x20] sm:$0xff] }
 0x304   : > { %v1451_v19 = vld [vmem:[#allocation4 + $0x8] sm:$0xff] }
 0x305   : > { %1623 = vmatprep.mubr.f32.mxu0 %v1451_v19  ;;  %v1455_v15 = vld [vmem:[#allocation4 + $0x28] sm:$0xff] }
 0x306   : > { %1624 = vmatmul.mubr.f32.vlgmr.msra.gmra.mrb[4].mxu0 %v1450_v18 }
 0x307   : > { %2680 = vmatpush3.bf16.msra.mxu0 %v2679_v37  ;;  %1763 = vmatprep.mubr.f32.mxu0 %v1455_v15 }
 0x308   : > { %2682 = vmatprep.subr.bf16.mxu0 %v2681_v17 }
 0x30b   : > { %2684 = vmatpush3.bf16.msra.mxu0 %v2683_v16 }
 0x30c   : > { %2686 = vmatprep.subr.bf16.mxu0 %v2685_v48 }
 0x30f   : > { %2688 = vmatpush3.bf16.msra.mxu0 %v2687_v61  ;;  %v1874_v61 = vld [vmem:[#allocation10 + $0x20] sm:$0xff] }
 0x310   : > { %2690 = vmatprep.subr.bf16.mxu0 %v2689_v54  ;;  %v1883_v54 = vld [vmem:[#allocation10 + $0x68] sm:$0xff]  ;;  %v2711_v25 = vpack.c.bf16 %v1874_v61, %v1870_v8 }
 0x311   : > { %v2081_v61 = vld [vmem:[%s4238_s7 + $0x38] sm:$0xff] }
 0x312   : > { %2712 = vmatpush1.bf16.msra.mxu1 %v2711_v25 }
 0x313   : > { %2692 = vmatpush3.bf16.msra.mxu0 %v2691_v53  ;;  %v1882_v53 = vld [vmem:[#allocation10 + $0x60] sm:$0xff] }
 0x314   : > { %2694 = vmatprep.subr.bf16.mxu0 %v2693_v57  ;;  %v1887_v57 = vld [vmem:[#allocation10 + $0x88] sm:$0xff]  ;;  %v2715_v11 = vpack.c.bf16 %v1882_v53, %v1878_v42  ;;  %v2083_v42 = vld [vmem:[%s4238_s7 + $0x48] sm:$0xff]  ;;  %v2100_v53 = vld [vmem:[%s4238_s7 + $0xd0] sm:$0xff] }
 0x317   : > { %2696 = vmatpush3.bf16.msra.mxu0 %v2695_v34  ;;  %v2717_v34 = vpack.c.bf16 %v1891_v28, %v1887_v57  ;;  %v2101_v57 = vld [vmem:[%s4238_s7 + $0xd8] sm:$0xff]  ;;  %v2084_v28 = vld [vmem:[%s4238_s7 + $0x50] sm:$0xff] }
 0x318   : > { %2698 = vmatprep.subr.bf16.mxu0 %v2697_v10 }
 0x31b   : > { %2700 = vmatpush3.bf16.msra.mxu0 %v2699_v52 }
 0x31c   : > { %2702 = vmatprep.subr.bf16.mxu0 %v2701_v4  ;;  %v2719_v4 = vpack.c.bf16 %v1890_v23, %v1886_v7 }
 0x31f   : > { %2704 = vmatpush3.bf16.msra.mxu0 %v2703_v27 }
 0x320   : > { %2706 = vmatprep.subr.bf16.mxu0 %v2705_v32 }
 0x323   : > { %2708 = vmatpush3.bf16.msra.mxu0 %v2707_v14  ;;  %v1877_v14 = vld [vmem:[#allocation10 + $0x38] sm:$0xff] }
 0x326   : > { %1764 = vmatmul.mubr.f32.vlgmr.msra.gmra.mrb[6].mxu0 %v1454_v49 }
 0x3cf   : > { %v2481_v9 = vpop.f32.mrb[4].mxu1 }
 0x3d0   : > { %v2482_v51 = vpop.f32.mrb[5].mxu1 }
 0x3d1   : > { %v2483_v35 = vadd.f32 %v2482_v51, %v2481_v9  ;;  %v2723_v9 = vpack.c.bf16 %v1898_v38, %v1894_v30  ;;  %v1881_v30 = vld [vmem:[#allocation10 + $0x58] sm:$0xff] }
 0x3d2   : > { %v1885_v38 = vld [vmem:[#allocation10 + $0x78] sm:$0xff] }
 0x3d9   : > { %v2446_v55 = vpop.f32.mrb[4].mxu0 }
 0x3da   : > { %v2447_v12 = vpop.f32.mrb[5].mxu0 }
 0x3db   : > { %v2448_v36 = vadd.f32 %v2447_v12, %v2446_v55 }
 0x3dd   : > { %v1626_v33 = vadd.f32 %v2448_v36, %v2402_v3  ;;  %v2725_v3 = vpack.c.bf16 %v1877_v14, %v1873_v13  ;;  %v1889_v14 = vld [vmem:[#allocation10 + $0x98] sm:$0xff] }
 0x3df   : > { %v1696_v60 = vadd.f32 %v2483_v35, %v1626_v33 }
 0x3f9   : > { %v2516_v39 = vpop.f32.mrb[6].mxu0 }
 0x3fa   : > { %v2517_v26 = vpop.f32.mrb[7].mxu0 }
 0x3fb   : > { %v2518_v29 = vadd.f32 %v2517_v26, %v2516_v39  ;;  %v2091_v39 = vld [vmem:[%s4238_s7 + $0x88] sm:$0xff]  ;;  %v2074_v26 = vld [vmem:[%s4238_s7] sm:$0xff] }
 0x3fd   : > { %v1766_v5 = vadd.f32 %v2518_v29, %v1696_v60  ;;  %v2090_v60 = vld [vmem:[%s4238_s7 + $0x80] sm:$0xff] }
 0x3fe   : > { %v2741_v29 = vpack.c.bf16 %v2091_v39, %v2090_v60  ;;  %v1896_v60 = vld [vmem:[#allocation10 + $0xd0] sm:$0xff] }
 0x3ff   : > { %v1769_v62 = vmax.f32 %v1766_v5, 0.0  ;;  %v2075_v5 = vld [vmem:[%s4238_s7 + $0x8] sm:$0xff] }
 0x400   : > { %2742 = vmatprep.subr.bf16.mxu0 %v2741_v29  ;;  %v1900_v39 = vld [vmem:[#allocation10 + $0xf0] sm:$0xff] }
 0x401   : > { %v1771_v40 = vcombine.high %v1769_v62, %v1769_v62  ;;  %v1778_v37 = vrot.slane %v1769_v62, %v3266_v6  ;;  %v2092_v62 = vld [vmem:[%s4238_s7 + $0x90] sm:$0xff]  ;;  %v2739_v29 = vpack.c.bf16 %v1900_v39, %v1896_v60  ;;  %v4276_v60 = vsub.s32 1, %v3247_v46 }
 0x403   : > { %v1785_v19 = vrot.slane %v1771_v40, %v3266_v6  ;;  %v2403_v17 = vrot.slane %v1778_v37, 9  ;;  %v1786_v44 = vcombine.high %v1778_v37, %v1778_v37  ;;  %v1879_v6 = vld [vmem:[#allocation10 + $0x48] sm:$0xff] }
 0x404   : > { %v2713_v31 = vpack.c.bf16 %v1883_v54, %v1879_v6  ;;  %v2093_v40 = vld [vmem:[%s4238_s7 + $0x98] sm:$0xff]  ;;  %v2098_v6 = vld [vmem:[%s4238_s7 + $0xc0] sm:$0xff]  ;;  %v2099_v54 = vld [vmem:[%s4238_s7 + $0xc8] sm:$0xff] }
 0x405   : > { %v1804_v24 = vmax.f32 %v1778_v37, %v2403_v17  ;;  %v2404_v18 = vrot.slane %v1786_v44, 9  ;;  %v2405_v41 = vrot.slane %v1785_v19, 9  ;;  %v1787_v2 = vcombine.high %v1785_v19, %v1785_v19  ;;  %v2076_v17 = vld [vmem:[%s4238_s7 + $0x10] sm:$0xff] }
 0x406   : > { %2714 = vmatprep.subr.bf16.mxu1 %v2713_v31  ;;  %v2743_v37 = vpack.c.bf16 %v2075_v5, %v2074_v26  ;;  %v2757_v25 = vpack.c.bf16 %v2099_v54, %v2098_v6  ;;  %v2082_v31 = vld [vmem:[%s4238_s7 + $0x40] sm:$0xff]  ;;  %v2128_v6 = vld [vmem:[%s4238_s7 + $0x1b0] sm:$0xff]  ;;  %v2129_v54 = vld [vmem:[%s4238_s7 + $0x1b8] sm:$0xff] }
 0x407   : > { %1812 = vrot.lane.b32.xlu0 %v1804_v24, %s3020_s20  ;;  %v1805_v15 = vmax.f32 %v1786_v44, %v2404_v18  ;;  %v2406_v16 = vrot.slane %v1787_v2, 9  ;;  %v1806_v48 = vmax.f32 %v1785_v19, %v2405_v41  ;;  %2716 = vmatpush1.bf16.msra.mxu1 %v2715_v11  ;;  %v2745_v19 = vpack.c.bf16 %v2093_v40, %v2092_v62  ;;  %v2077_v44 = vld [vmem:[%s4238_s7 + $0x18] sm:$0xff]  ;;  %v2095_v18 = vld [vmem:[%s4238_s7 + $0xa8] sm:$0xff]  ;;  %v2122_v26 = vld [vmem:[%s4238_s7 + $0x180] sm:$0xff] }
 0x408   : > { %2718 = vmatprep.subr.bf16.mxu1 %v2717_v34  ;;  %2744 = vmatpush3.bf16.msra.mxu0 %v2743_v37  ;;  %v2747_v41 = vpack.c.bf16 %v2077_v44, %v2076_v17  ;;  %v2761_v11 = vpack.c.bf16 %v2101_v57, %v2100_v53  ;;  %v2102_v34 = vld [vmem:[%s4238_s7 + $0xe0] sm:$0xff]  ;;  %v2107_v40 = vld [vmem:[%s4238_s7 + $0x108] sm:$0xff]  ;;  %v2124_v37 = vld [vmem:[%s4238_s7 + $0x190] sm:$0xff] }
 0x409   : > { %1814 = vrot.lane.b32.xlu1 %v1805_v15, %s3020_s20  ;;  %v1807_v45 = vmax.f32 %v1787_v2, %v2406_v16  ;;  %2746 = vmatprep.subr.bf16.mxu0 %v2745_v19  ;;  %v2079_v16 = vld [vmem:[%s4238_s7 + $0x28] sm:$0xff]  ;;  %v2106_v62 = vld [vmem:[%s4238_s7 + $0x100] sm:$0xff]  ;;  %v2125_v19 = vld [vmem:[%s4238_s7 + $0x198] sm:$0xff] }
 0x40a   : > { %v2775_v17 = vpack.c.bf16 %v2107_v40, %v2106_v62  ;;  %v2777_v44 = vpack.c.bf16 %v2125_v19, %v2124_v37  ;;  %v2113_v53 = vld [vmem:[%s4238_s7 + $0x138] sm:$0xff]  ;;  %v4277_v37 = vsub.s32 2, %v3247_v46 }
 0x40b   : > { %1816 = vrot.lane.b32.xlu0 %v1806_v48, %s3020_s20  ;;  %2720 = vmatpush1.bf16.msra.mxu1 %v2719_v4  ;;  %v1872_v4 = vld [vmem:[#allocation10 + $0x10] sm:$0xff] }
 0x40c   : > { %2722 = vmatprep.subr.bf16.mxu1 %v2721_v59  ;;  %2748 = vmatpush3.bf16.msra.mxu0 %v2747_v41  ;;  %v1884_v59 = vld [vmem:[#allocation10 + $0x70] sm:$0xff] }
 0x40d   : > { %1818 = vrot.lane.b32.xlu1 %v1807_v45, %s3020_s20  ;;  %v2126_v41 = vld [vmem:[%s4238_s7 + $0x1a0] sm:$0xff] }
 0x40f   : > { %2724 = vmatpush1.bf16.msra.mxu1 %v2723_v9 }
 0x410   : > { %2726 = vmatprep.subr.bf16.mxu1 %v2725_v3  ;;  %v1897_v3 = vld [vmem:[#allocation10 + $0xd8] sm:$0xff] }
 0x479   : > { %v1813_v21 = vpop.permute.xlu0 %1812 }
 0x47a   : > { %v1824_v0 = vmax.f32 %v1804_v24, %v1813_v21  ;;  %v2094_v24 = vld [vmem:[%s4238_s7 + $0xa0] sm:$0xff]  ;;  %v2759_v21 = vpack.c.bf16 %v2083_v42, %v2082_v31  ;;  %v2105_v31 = vld [vmem:[%s4238_s7 + $0xf8] sm:$0xff]  ;;  %v2112_v42 = vld [vmem:[%s4238_s7 + $0x130] sm:$0xff] }
 0x47b   : > { %v1815_v10 = vpop.permute.xlu1 %1814  ;;  %v2749_v2 = vpack.c.bf16 %v2095_v18, %v2094_v24  ;;  %v2108_v24 = vld [vmem:[%s4238_s7 + $0x110] sm:$0xff]  ;;  %v2109_v18 = vld [vmem:[%s4238_s7 + $0x118] sm:$0xff] }
 0x47c   : > { %v1825_v20 = vmax.f32 %v1805_v15, %v1815_v10  ;;  %v1835_v56 = vrot.slane %v1824_v0, %v3250_v47  ;;  %v2078_v15 = vld [vmem:[%s4238_s7 + $0x20] sm:$0xff]  ;;  %v2085_v0 = vld [vmem:[%s4238_s7 + $0x58] sm:$0xff]  ;;  %v2103_v10 = vld [vmem:[%s4238_s7 + $0xe8] sm:$0xff] }
 0x47d   : > { %v1817_v52 = vpop.permute.xlu0 %1816  ;;  %v2751_v43 = vpack.c.bf16 %v2079_v16, %v2078_v15  ;;  %2750 = vmatprep.subr.bf16.mxu0 %v2749_v2  ;;  %v2765_v7 = vpack.c.bf16 %v2103_v10, %v2102_v34  ;;  %v2127_v2 = vld [vmem:[%s4238_s7 + $0x1a8] sm:$0xff]  ;;  %v2779_v15 = vpack.c.bf16 %v2109_v18, %v2108_v24 }
 0x47e   : > { %v1839_v27 = vrot.slane %v1825_v20, %v3250_v47  ;;  %v1826_v32 = vmax.f32 %v1806_v48, %v1817_v52  ;;  %v2096_v48 = vld [vmem:[%s4238_s7 + $0xb0] sm:$0xff]  ;;  %v2763_v20 = vpack.c.bf16 %v2085_v0, %v2084_v28  ;;  %v2781_v16 = vpack.c.bf16 %v2127_v2, %v2126_v41  ;;  %v2089_v28 = vld [vmem:[%s4238_s7 + $0x78] sm:$0xff]  ;;  %v2130_v0 = vld [vmem:[%s4238_s7 + $0x1c0] sm:$0xff] }
 0x47f   : > { %v1819_v49 = vpop.permute.xlu1 %1818  ;;  %v2753_v8 = vpack.c.bf16 %v2097_v58, %v2096_v48  ;;  %2752 = vmatpush3.bf16.msra.mxu0 %v2751_v43  ;;  %v2110_v48 = vld [vmem:[%s4238_s7 + $0x120] sm:$0xff]  ;;  %v2111_v58 = vld [vmem:[%s4238_s7 + $0x128] sm:$0xff] }
 0x480   : > { %v1848_v51 = vsel %vm826_vm6, %v1839_v27, %v1835_v56  ;;  %v1843_v35 = vrot.slane %v1826_v32, %v3250_v47  ;;  %v1827_v55 = vmax.f32 %v1807_v45, %v1819_v49  ;;  %v2755_v45 = vpack.c.bf16 %v2081_v61, %v2080_v1  ;;  %v1880_v32 = vld [vmem:[#allocation10 + $0x50] sm:$0xff]  ;;  %v1893_v49 = vld [vmem:[#allocation10 + $0xb8] sm:$0xff] }
 0x481   : > { %2754 = vmatprep.subr.bf16.mxu0 %v2753_v8  ;;  %v2727_v56 = vpack.c.bf16 %v1876_v63, %v1872_v4  ;;  %v2729_v27 = vpack.c.bf16 %v1885_v38, %v1881_v30  ;;  %v2731_v9 = vpack.c.bf16 %v1884_v59, %v1880_v32  ;;  %v2783_v43 = vpack.c.bf16 %v2111_v58, %v2110_v48  ;;  %v2086_v8 = vld [vmem:[%s4238_s7 + $0x60] sm:$0xff]  ;;  %v2087_v1 = vld [vmem:[%s4238_s7 + $0x68] sm:$0xff]  ;;  %v2133_v4 = vld [vmem:[%s4238_s7 + $0x1d8] sm:$0xff] }
 0x482   : > { %v1847_v12 = vrot.slane %v1827_v55, %v3250_v47  ;;  %v1849_v36 = vsel %vm828_vm7, %v1843_v35, %v1848_v51  ;;  %v2733_v51 = vpack.c.bf16 %v1893_v49, %v1889_v14  ;;  %v1888_v35 = vld [vmem:[#allocation10 + $0x90] sm:$0xff]  ;;  %v2767_v61 = vpack.c.bf16 %v2087_v1, %v2086_v8  ;;  %v2116_v30 = vld [vmem:[%s4238_s7 + $0x150] sm:$0xff]  ;;  %v2117_v38 = vld [vmem:[%s4238_s7 + $0x158] sm:$0xff] }
 0x483   : > { %2756 = vmatpush3.bf16.msra.mxu0 %v2755_v45  ;;  %v1892_v55 = vld [vmem:[#allocation10 + $0xb0] sm:$0xff]  ;;  %v2104_v45 = vld [vmem:[%s4238_s7 + $0xf0] sm:$0xff]  ;;  %v2795_v32 = vpack.c.bf16 %v2117_v38, %v2116_v30  ;;  %vm2291_vm6 = vcmask 519168  }
 0x484   : > { %v1850_v33 = vsel %vm830_vm8, %v1847_v12, %v1849_v36  ;;  %2758 = vmatprep.subr.bf16.mxu0 %v2757_v25  ;;  %v1901_v12 = vld [vmem:[#allocation10 + $0xf8] sm:$0xff]  ;;  %v2735_v36 = vpack.c.bf16 %v1892_v55, %v1888_v35  ;;  %v2785_v25 = vpack.c.bf16 %v2129_v54, %v2128_v6  ;;  %v2769_v57 = vpack.c.bf16 %v2105_v31, %v2104_v45 }
 0x485   : > { %1859 = vrot.lane.b32.xlu1 %v1850_v33, %s3019_s12  ;;  %1854 = vrot.lane.b32.xlu0 %v1850_v33, %s3020_s20  ;;  %1853 = vst.msk [vmem:[#allocation5] sm:$0xf] %vm1852_vm1, %v1850_v33  ;;  %v2131_v10 = vld [vmem:[%s4238_s7 + $0x1c8] sm:$0xff]  ;;  %v2120_v35 = vld [vmem:[%s4238_s7 + $0x170] sm:$0xff]  ;;  %s379_s12 = scalar_lea.vmem %s4240_s9, %s2389_s25 }
 0x486   : > { %v2119_v14 = vld [vmem:[%s4238_s7 + $0x168] sm:$0xff] }
 0x487   : > { %2760 = vmatpush3.bf16.msra.mxu0 %v2759_v21  ;;  %v2787_v21 = vpack.c.bf16 %v2113_v53, %v2112_v42 }
 0x488   : > { %2762 = vmatprep.subr.bf16.mxu0 %v2761_v11  ;;  %v2088_v11 = vld [vmem:[%s4238_s7 + $0x70] sm:$0xff] }
 0x489   : > { %1864 = vrot.lane.b32.xlu0 %v1850_v33, %s3021_s28  ;;  %v2737_v33 = vpack.c.bf16 %v1901_v12, %v1897_v3  ;;  %v2771_v34 = vpack.c.bf16 %v2089_v28, %v2088_v11  ;;  %v2121_v3 = vld [vmem:[%s4238_s7 + $0x178] sm:$0xff] }
 0x48a   : > { %v2803_v12 = vpack.c.bf16 %v2121_v3, %v2120_v35 }
 0x48b   : > { %2764 = vmatpush3.bf16.msra.mxu0 %v2763_v20  ;;  %v2114_v20 = vld [vmem:[%s4238_s7 + $0x140] sm:$0xff] }
 0x48c   : > { %2766 = vmatprep.subr.bf16.mxu0 %v2765_v7  ;;  %v2115_v7 = vld [vmem:[%s4238_s7 + $0x148] sm:$0xff] }
 0x48f   : > { %2768 = vmatpush3.bf16.msra.mxu0 %v2767_v61 }
 0x490   : > { %2770 = vmatprep.subr.bf16.mxu0 %v2769_v57 }
 0x493   : > { %2772 = vmatpush3.bf16.msra.mxu0 %v2771_v34 }
 0x4f7   : > { %v1860_v23 = vpop.permute.xlu1 %1859  ;;  %v1855_v50 = vpop.permute.xlu0 %1854 }
 0x4f8   : > { %1858 = vst.msk [vmem:[#allocation5] sm:$0xf] %vm1857_vm2, %v1855_v50  ;;  %v2791_v50 = vpack.c.bf16 %v2115_v7, %v2114_v20 }
 0x4f9   : > { %1863 = vst.msk [vmem:[#allocation5] sm:$0xf] %vm1862_vm3, %v1860_v23  ;;  %v2789_v23 = vpack.c.bf16 %v2131_v10, %v2130_v0 }
 0x4fb   : > { %v1865_v52 = vpop.permute.xlu0 %1864 }
 0x4fc   : > { %1868 = vst.msk [vmem:[#allocation5] sm:$0xf] %vm1867_vm4, %v1865_v52  ;;  %v2132_v52 = vld [vmem:[%s4238_s7 + $0x1d0] sm:$0xff] }
 0x4fd   : > { %v2793_v63 = vpack.c.bf16 %v2133_v4, %v2132_v52 }
 0x503   : > { %v1869_v13 = vld [vmem:[#allocation5] sm:$0xf] }
 0x504   : > { %2407 = vmatmul.mubr.msk.f32.vlgmr.msra.gmra.mrb[6].mxu1 %vm1924_vm5, %v1869_v13 }
 0x505   : > { %2728 = vmatpush1.bf16.msra.mxu1 %v2727_v56  ;;  %2063 = vmatprep.mubr.f32.mxu1 %v4275_v22  ;;  %v2123_v22 = vld [vmem:[%s4238_s7 + $0x188] sm:$0xff]  ;;  %v2134_v56 = vld [vmem:[%s4238_s7 + $0x1e0] sm:$0xff] }
 0x506   : > { %2730 = vmatprep.subr.bf16.mxu1 %v2729_v27  ;;  %v2773_v5 = vpack.c.bf16 %v2123_v22, %v2122_v26  ;;  %v2135_v27 = vld [vmem:[%s4238_s7 + $0x1e8] sm:$0xff] }
 0x507   : > { %v2797_v59 = vpack.c.bf16 %v2135_v27, %v2134_v56 }
 0x509   : > { %2732 = vmatpush1.bf16.msra.mxu1 %v2731_v9  ;;  %v2136_v9 = vld [vmem:[%s4238_s7 + $0x1f0] sm:$0xff] }
 0x50a   : > { %2734 = vmatprep.subr.bf16.mxu1 %v2733_v51  ;;  %v2137_v51 = vld [vmem:[%s4238_s7 + $0x1f8] sm:$0xff] }
 0x50b   : > { %v2801_v55 = vpack.c.bf16 %v2137_v51, %v2136_v9 }
 0x50d   : > { %2736 = vmatpush1.bf16.msra.mxu1 %v2735_v36  ;;  %v1902_v36 = vld [vmem:[%s4237_s6] sm:$0xf] }
 0x50e   : > { %2738 = vmatprep.subr.bf16.mxu1 %v2737_v33  ;;  %v1907_v33 = vrot.slane %v1902_v36, %v3250_v47  ;;  %v1911_v39 = vrot.slane %v1902_v36, %v4276_v60  ;;  %v1915_v19 = vrot.slane %v1902_v36, %v4277_v37 }
 0x511   : > { %2740 = vmatpush1.bf16.msra.mxu1 %v2739_v29 }
 0x512   : > { %2774 = vmatprep.subr.bf16.mxu1 %v2773_v5 }
 0x514   : > { %2408 = vmatmul.mubr.msk.f32.vlgmr.msra.gmra.mrb[8].mxu1 %vm1924_vm5, %v1869_v13  ;;  %v2118_v13 = vld [vmem:[%s4238_s7 + $0x160] sm:$0xff] }
 0x515   : > { %2776 = vmatpush3.bf16.msra.mxu1 %v2775_v17  ;;  %v2799_v49 = vpack.c.bf16 %v2119_v14, %v2118_v13  ;;  %v4278_v17 = vsub.s32 3, %v3247_v46 }
 0x516   : > { %2778 = vmatprep.subr.bf16.mxu1 %v2777_v44 }
 0x517   : > { %v1919_v44 = vrot.slane %v1902_v36, %v4278_v17 }
 0x519   : > { %2780 = vmatpush3.bf16.msra.mxu1 %v2779_v15 }
 0x51a   : > { %2782 = vmatprep.subr.bf16.mxu1 %v2781_v16 }
 0x51d   : > { %2784 = vmatpush3.bf16.msra.mxu1 %v2783_v43  ;;  %v2409_v43 = vld [vmem:[%s4239_s8] ss:$0 sm:$0xff] }
 0x51e   : > { %2786 = vmatprep.subr.bf16.mxu1 %v2785_v25 }
 0x521   : > { %2788 = vmatpush3.bf16.msra.mxu1 %v2787_v21 }
 0x522   : > { %2790 = vmatprep.subr.bf16.mxu1 %v2789_v23 }
 0x525   : > { %2792 = vmatpush3.bf16.msra.mxu1 %v2791_v50 }
 0x526   : > { %2794 = vmatprep.subr.bf16.mxu1 %v2793_v63 }
 0x529   : > { %2796 = vmatpush3.bf16.msra.mxu1 %v2795_v32 }
 0x52a   : > { %2798 = vmatprep.subr.bf16.mxu1 %v2797_v59 }
 0x52d   : > { %2800 = vmatpush3.bf16.msra.mxu1 %v2799_v49 }
 0x52e   : > { %2802 = vmatprep.subr.bf16.mxu1 %v2801_v55 }
 0x531   : > { %2804 = vmatpush3.bf16.msra.mxu1 %v2803_v12 }
 0x5d7   : > { %v1994_v26 = vpop.f32.mrb[6].mxu1 }
 0x5d8   : > { %v1995_v22 = vadd.f32 %v1994_v26, %v1907_v33  ;;  %v1996_v29 = vpop.f32.mrb[7].mxu1 }
 0x5d9   : > { %v1997_v5 = vadd.f32 %v1996_v29, %v1911_v39 }
 0x5da   : > { %v2070_v40 = vmax.f32 %v1995_v22, 0.0 }
 0x5db   : > { %v2071_v62 = vmax.f32 %v1997_v5, 0.0 }
 0x5dd   : > { %2209 = vmatprep.mubr.f32.mxu0 %v2071_v62 }
 0x5de   : > { %2210 = vmatmul.mubr.f32.vlgmr.msra.gmra.mrb[8].mxu0 %v2070_v40 }
 0x5e7   : > { %v2065_v24 = vpop.f32.mrb[8].mxu1 }
 0x5e8   : > { %v2066_v18 = vadd.f32 %v2065_v24, %v1915_v19  ;;  %v2067_v47 = vpop.f32.mrb[9].mxu1 }
 0x5e9   : > { %v2068_v41 = vadd.f32 %v2067_v47, %v1919_v44 }
 0x5ea   : > { %v2072_v15 = vmax.f32 %v2066_v18, 0.0 }
 0x5eb   : > { %v2073_v2 = vmax.f32 %v2068_v41, 0.0 }
 0x5ed   : > { %2279 = vmatprep.mubr.f32.mxu1 %v2073_v2 }
 0x5ee   : > { %2280 = vmatmul.mubr.f32.vlgmr.msra.gmra.mrb[10].mxu1 %v2072_v15 }
 0x6b1   : > { %v2551_v16 = vpop.f32.mrb[8].mxu0 }
 0x6b2   : > { %v2552_v48 = vpop.f32.mrb[9].mxu0 }
 0x6b3   : > { %v2553_v58 = vadd.f32 %v2552_v48, %v2551_v16 }
 0x6b5   : > { %v2212_v1 = vadd.f32 %v2553_v58, %v2409_v43 }
 0x6c1   : > { %v2586_v8 = vpop.f32.mrb[10].mxu1 }
 0x6c2   : > { %v2587_v46 = vpop.f32.mrb[11].mxu1 }
 0x6c3   : > { %v2588_v61 = vadd.f32 %v2587_v46, %v2586_v8 }
 0x6c5   : > { %v2282_v6 = vadd.f32 %v2588_v61, %v2212_v1 }
 0x6c7   : > { %v2410_v54 = vmul.f32 -1.442695, %v2282_v6 }
 0x6c9   : > { %2877 = vpow2.f32 %v2410_v54 }
 0x6d3   : > { %v2878_v45 = vpop.eup %2877 }
 0x6d4   : > { %v2288_v25 = vadd.f32 1.0, %v2878_v45 }
 0x6d6   : > { %2879 = vrcp.f32 %v2288_v25 }
 0x6e0   : > { %v2880_v31 = vpop.eup %2879 }
 0x6e1   : > { %2292 = vst.msk [vmem:[%s379_s12] sm:$0xf] %vm2291_vm6, %v2880_v31 }
 0x6e2 PF: > { %p20_p9 = scmp.ge.s32.totalorder %s3165_s19, 4   ;;  %s4279_s30 = smov %s2997_s10 }
 0x6e3   : > { %s4280_s10 = smov %s3001_s11  ;;  %s4281_s11 = smov %s3176_s23 }
 0x6e4   : > { %s4282_s12 = smov %s3165_s19  ;;  %22 = sbr.rel (!%p20_p9) target bundleno = 4 (0x4), region = 104 }
 0x6eb   :  { %2312 = vsyncpa [#allocation7], 1 }
 0x6ec   :  { %2314 = vsyncpa [#allocation7 + $0x1], 1 }
 0x6ed   :  { %2315 = vsyncpa [#allocation9], 1 }

</bundles_post_ra>
